<compile_context>
chip_gen: v6e
topology: v6e:2x2x1
jax: 0.10.0
libtpu: 0.0.40
codegen_flags: <defaults>
</compile_context>

<pallas_src>
import functools

import jax
import jax.numpy as jnp
from jax.experimental import pallas as pl
from jax.experimental.pallas import tpu as pltpu

EPS = 1e-5  # torch nn.LayerNorm default


# ---------------------------------------------------------------------------
# helpers
# ---------------------------------------------------------------------------
def _pick_tile_rows(rows, max_tile=512):
    # Full extent when small (always legal); otherwise a 512-row tile
    # (multiple of 8) -- the final partial block is clipped by Pallas.
    return rows if rows <= max_tile else max_tile


def _pick_tile_cols(d_out, max_tile=512):
    if d_out <= max_tile:
        return d_out                       # full width (legal: equals array dim)
    for t in (512, 256, 384, 128):         # prefer 256-multiples (2x256^2 MXU)
        if d_out % t == 0:
            return t
    return 512                             # multiple of 128; final block clipped


def _vmem_limit(*tile_bytes):
    est = 2 * sum(tile_bytes) + (4 << 20)  # double-buffered tiles + margin
    return int(min(max(est, 24 << 20), 48 << 20))   # <=48 MiB: v7x headroom


def _erf_approx(x):
    # Abramowitz & Stegun 7.1.26, |err| <= 1.5e-7 (well below MXU/bf16 noise),
    # built only from exp/mul/add/where so it lowers cleanly in Mosaic while
    # keeping the exact-GELU semantics of torch nn.GELU().
    p = 0.3275911
    a1, a2, a3, a4, a5 = (0.254829592, -0.284496736, 1.421413741,
                          -1.453152027, 1.061405429)
    sgn = jnp.where(x >= 0.0, 1.0, -1.0)
    ax = jnp.abs(x)
    t = pl.reciprocal(1.0 + p * ax, approx=True)     # EUP slot, off the VALU path
    poly = t * (a1 + t * (a2 + t * (a3 + t * (a4 + t * a5))))
    return sgn * (1.0 - poly * jnp.exp(-ax * ax))


def _gelu_exact(x):
    return 0.5 * x * (1.0 + _erf_approx(x * 0.7071067811865476))


# ---------------------------------------------------------------------------
# Kernel 1: fused LayerNorm + Linear (+ optional GELU), LN hoisted over j
# ---------------------------------------------------------------------------
def _ln_linear_kernel(x_ref, g_ref, b_ref, w_ref, bias_ref, o_ref, y_ref, *,
                      activation):
    # x: (tm, D); g/b: (1, D); w: (D, tn); bias: (1, tn); o: (tm, tn)
    # y_ref: (tm, D) VMEM scratch holding the LN output in the weight dtype,
    # computed once per row tile and reused for every output-column tile.
    @pl.when(pl.program_id(1) == 0)
    def _():
        x = x_ref[...].astype(jnp.float32)
        mean = jnp.mean(x, axis=-1, keepdims=True)
        c = x - mean
        var = jnp.mean(c * c, axis=-1, keepdims=True)        # biased, like torch
        xn = c * jax.lax.rsqrt(var + EPS)
        y = xn * g_ref[...].astype(jnp.float32) + b_ref[...].astype(jnp.float32)
        y_ref[...] = y.astype(y_ref.dtype)

    acc = jnp.dot(y_ref[...], w_ref[...], preferred_element_type=jnp.float32)
    acc = acc + bias_ref[...].astype(jnp.float32)
    if activation == "gelu":
        acc = _gelu_exact(acc)
    o_ref[...] = acc.astype(o_ref.dtype)


def ln_linear(x2, gamma, beta, w, bias, *, activation=None, max_tile_rows=512):
    """x2: (rows, D) -> LayerNorm(D) -> @ w + bias [-> GELU] -> (rows, D_out)."""
    rows, D = x2.shape
    D_out = w.shape[1]
    tm = _pick_tile_rows(rows, max_tile_rows)
    tn = _pick_tile_cols(D_out)
    # TODO(synk): add a K (reduction-dim) grid axis + f32 VMEM accumulator once
    #             D grows beyond a few K and the (tm,D)/(D,tn) tiles stop fitting.

    g2 = gamma.reshape(1, D)
    b2 = beta.reshape(1, D)
    bias2 = bias.reshape(1, D_out)

    isz = jnp.dtype(x2.dtype).itemsize
    wsz = jnp.dtype(w.dtype).itemsize
    vmem = _vmem_limit(tm * D * isz, tm * D * wsz, D * tn * wsz, tm * tn * isz)

    return pl.pallas_call(
        functools.partial(_ln_linear_kernel, activation=activation),
        out_shape=jax.ShapeDtypeStruct((rows, D_out), x2.dtype),
        grid_spec=pltpu.PrefetchScalarGridSpec(
            num_scalar_prefetch=0,
            grid=(pl.cdiv(rows, tm), pl.cdiv(D_out, tn)),
            in_specs=[
                pl.BlockSpec((tm, D), lambda i, j: (i, 0)),      # x row tile
                pl.BlockSpec((1, D), lambda i, j: (0, 0)),       # gamma
                pl.BlockSpec((1, D), lambda i, j: (0, 0)),       # beta
                pl.BlockSpec((D, tn), lambda i, j: (0, j)),      # weight col tile
                pl.BlockSpec((1, tn), lambda i, j: (0, j)),      # bias
            ],
            out_specs=pl.BlockSpec((tm, tn), lambda i, j: (i, j)),
            scratch_shapes=[pltpu.VMEM((tm, D), w.dtype)],       # cached LN out
        ),
        compiler_params=pltpu.CompilerParams(
            dimension_semantics=("parallel", "arbitrary"),
            vmem_limit_bytes=vmem,
        ),
    )(x2, g2, b2, w, bias2)


# ---------------------------------------------------------------------------
# Kernel 2: attention core -- all heads of one batch element per grid step
# ---------------------------------------------------------------------------
def _attention_kernel(qkv_ref, o_ref, *, H, Dh, scale):
    # qkv_ref: (N, 3*H*Dh) for one batch element; o_ref: (N, H*Dh)
    inner = H * Dh
    for h in range(H):                               # unrolled: H small, static
        q = qkv_ref[:, h * Dh:(h + 1) * Dh]
        k = qkv_ref[:, inner + h * Dh: inner + (h + 1) * Dh]
        v = qkv_ref[:, 2 * inner + h * Dh: 2 * inner + (h + 1) * Dh]
        s = jax.lax.dot_general(q, k, (((1,), (1,)), ((), ())),
                                preferred_element_type=jnp.float32) * scale
        s = s - jnp.max(s, axis=-1, keepdims=True)
        p = jnp.exp(s)
        l = jnp.sum(p, axis=-1, keepdims=True)
        o = jnp.dot(p.astype(v.dtype), v, preferred_element_type=jnp.float32)
        o = o * pl.reciprocal(l, approx=True)
        o_ref[:, h * Dh:(h + 1) * Dh] = o.astype(o_ref.dtype)


def attention_core(qkv3, *, heads, dim_head, scale):
    """qkv3: (B, N, 3*H*Dh) fused projection -> (B, N, H*Dh) attention output.

    One grid step handles every head of one batch element, amortizing the
    per-step pipeline overhead over H heads and requiring no q/k/v transposes
    in the wrapper (the (rows, 3*inner) -> (B, N, 3*inner) reshape is free).
    """
    B, N, _ = qkv3.shape
    inner = heads * dim_head
    # TODO(synk): for long sequences switch to a kv-tiled flash-attention
    #             kernel -- this one keeps the full (N, N) score tile in VMEM.
    isz = jnp.dtype(qkv3.dtype).itemsize
    vmem = _vmem_limit(N * 3 * inner * isz, N * inner * isz,
                       N * N * 4, N * inner * 4)

    return pl.pallas_call(
        functools.partial(_attention_kernel, H=heads, Dh=dim_head, scale=scale),
        out_shape=jax.ShapeDtypeStruct((B, N, inner), qkv3.dtype),
        grid_spec=pltpu.PrefetchScalarGridSpec(
            num_scalar_prefetch=0,
            grid=(B,),
            in_specs=[pl.BlockSpec((None, N, 3 * inner), lambda b: (b, 0, 0))],
            out_specs=pl.BlockSpec((None, N, inner), lambda b: (b, 0, 0)),
        ),
        compiler_params=pltpu.CompilerParams(
            dimension_semantics=("parallel",),
            vmem_limit_bytes=vmem,
        ),
    )(qkv3)


# ---------------------------------------------------------------------------
# Kernel 3: Linear + bias + residual
# ---------------------------------------------------------------------------
def _linear_residual_kernel(x_ref, w_ref, bias_ref, r_ref, o_ref):
    acc = jnp.dot(x_ref[...].astype(w_ref.dtype), w_ref[...],
                  preferred_element_type=jnp.float32)
    acc = acc + bias_ref[...].astype(jnp.float32) + r_ref[...].astype(jnp.float32)
    o_ref[...] = acc.astype(o_ref.dtype)


def linear_residual(x2, w, bias, res2, *, max_tile_rows=512):
    """(rows, D_in) @ w + bias + res2 -> (rows, D_out)."""
    rows, D_in = x2.shape
    D_out = w.shape[1]
    tm = _pick_tile_rows(rows, max_tile_rows)
    tn = _pick_tile_cols(D_out)
    bias2 = bias.reshape(1, D_out)

    isz = jnp.dtype(x2.dtype).itemsize
    wsz = jnp.dtype(w.dtype).itemsize
    vmem = _vmem_limit(tm * D_in * isz, D_in * tn * wsz, 2 * tm * tn * isz)

    return pl.pallas_call(
        _linear_residual_kernel,
        out_shape=jax.ShapeDtypeStruct((rows, D_out), x2.dtype),
        grid_spec=pltpu.PrefetchScalarGridSpec(
            num_scalar_prefetch=0,
            grid=(pl.cdiv(rows, tm), pl.cdiv(D_out, tn)),
            in_specs=[
                pl.BlockSpec((tm, D_in), lambda i, j: (i, 0)),
                pl.BlockSpec((D_in, tn), lambda i, j: (0, j)),
                pl.BlockSpec((1, tn), lambda i, j: (0, j)),
                pl.BlockSpec((tm, tn), lambda i, j: (i, j)),
            ],
            out_specs=pl.BlockSpec((tm, tn), lambda i, j: (i, j)),
        ),
        compiler_params=pltpu.CompilerParams(
            dimension_semantics=("parallel", "parallel"),
            vmem_limit_bytes=vmem,
        ),
    )(x2, w, bias2, res2)


# ---------------------------------------------------------------------------
# Full Transformer forward
# ---------------------------------------------------------------------------
@functools.partial(jax.jit, static_argnames=("heads", "dim_head", "project_out"))
def transformer_forward(x, params, *, heads, dim_head, project_out):
    B, N, D = x.shape
    H, Dh = heads, dim_head
    inner = H * Dh
    scale = Dh ** -0.5
    rows = B * N

    for layer in params:
        a = layer["attn"]
        f = layer["ff"]

        # ---- x = Attention(LayerNorm(x)) + x ------------------------------
        x2 = x.reshape(rows, D)
        qkv = ln_linear(x2, a["ln_g"], a["ln_b"], a["w_qkv"],
                        jnp.zeros((3 * inner,), a["w_qkv"].dtype))  # to_qkv: no bias
        att = attention_core(qkv.reshape(B, N, 3 * inner),
                             heads=H, dim_head=Dh, scale=scale)
        att2 = att.reshape(rows, inner)                  # free view
        if project_out:
            x2 = linear_residual(att2, a["w_out"], a["b_out"], x2)
        else:
            x2 = att2 + x2                               # to_out == Identity
        # ---- x = FeedForward(LayerNorm(x)) + x ----------------------------
        h = ln_linear(x2, f["ln_g"], f["ln_b"], f["w1"], f["b1"],
                      activation="gelu")
        x2 = linear_residual(h, f["w2"], f["b2"], x2)
        x = x2.reshape(B, N, D)
    return x


# ---------------------------------------------------------------------------
# parameters + pure-JAX reference
# ---------------------------------------------------------------------------
def init_params(key, dim, depth, heads, dim_head, mlp_dim, dtype=jnp.float32):
    # Kernels are bf16-ready: pass dtype=jnp.bfloat16 to stream weights /
    # activations in bf16 (stats/softmax/accumulation stay f32 in-kernel).
    inner = heads * dim_head
    layers = []
    for _ in range(depth):
        key, *ks = jax.random.split(key, 12)
        attn = {
            "ln_g": 1.0 + 0.1 * jax.random.normal(ks[0], (dim,), dtype),
            "ln_b": 0.1 * jax.random.normal(ks[1], (dim,), dtype),
            "w_qkv": 0.05 * jax.random.normal(ks[2], (dim, 3 * inner), dtype),
            "w_out": 0.05 * jax.random.normal(ks[3], (inner, dim), dtype),
            "b_out": 0.05 * jax.random.normal(ks[4], (dim,), dtype),
        }
        ff = {
            "ln_g": 1.0 + 0.1 * jax.random.normal(ks[5], (dim,), dtype),
            "ln_b": 0.1 * jax.random.normal(ks[6], (dim,), dtype),
            "w1": 0.05 * jax.random.normal(ks[7], (dim, mlp_dim), dtype),
            "b1": 0.05 * jax.random.normal(ks[8], (mlp_dim,), dtype),
            "w2": 0.05 * jax.random.normal(ks[9], (mlp_dim, dim), dtype),
            "b2": 0.05 * jax.random.normal(ks[10], (dim,), dtype),
        }
        layers.append({"attn": attn, "ff": ff})
    return layers


def _layernorm_ref(x, g, b):
    xf = x.astype(jnp.float32)
    mean = jnp.mean(xf, axis=-1, keepdims=True)
    var = jnp.mean((xf - mean) ** 2, axis=-1, keepdims=True)
    return (xf - mean) * jax.lax.rsqrt(var + EPS) * g + b


def transformer_reference(x, params, *, heads, dim_head, project_out):
    B, N, D = x.shape
    H, Dh = heads, dim_head
    scale = Dh ** -0.5
    hp = jax.lax.Precision.HIGHEST
    for layer in params:
        a, f = layer["attn"], layer["ff"]
        y = _layernorm_ref(x, a["ln_g"], a["ln_b"])
        qkv = jnp.dot(y, a["w_qkv"], precision=hp).reshape(B, N, 3, H, Dh)
        q = jnp.transpose(qkv[:, :, 0], (0, 2, 1, 3))
        k = jnp.transpose(qkv[:, :, 1], (0, 2, 1, 3))
        v = jnp.transpose(qkv[:, :, 2], (0, 2, 1, 3))
        dots = jnp.einsum("bhid,bhjd->bhij", q, k, precision=hp) * scale
        attn = jax.nn.softmax(dots, axis=-1)
        out = jnp.einsum("bhij,bhjd->bhid", attn, v, precision=hp)
        out = jnp.transpose(out, (0, 2, 1, 3)).reshape(B, N, H * Dh)
        if project_out:
            out = jnp.dot(out, a["w_out"], precision=hp) + a["b_out"]
        x = (out + x).astype(x.dtype)

        y = _layernorm_ref(x, f["ln_g"], f["ln_b"])
        hmid = jax.nn.gelu(jnp.dot(y, f["w1"], precision=hp) + f["b1"],
                           approximate=False)
        x = (jnp.dot(hmid, f["w2"], precision=hp) + f["b2"] + x).astype(x.dtype)
    return x


if __name__ == "__main__":
    key = jax.random.PRNGKey(0)
    kx, kp = jax.random.split(key)

    # Small shapes consistent with Transformer(dim, depth, heads, dim_head, mlp_dim)
    B, N = 2, 8
    dim, depth, heads, dim_head, mlp_dim = 32, 2, 4, 8, 64
    project_out = not (heads == 1 and dim_head == dim)

    x = jax.random.normal(kx, (B, N, dim), dtype=jnp.float32)
    params = init_params(kp, dim, depth, heads, dim_head, mlp_dim)

    out = transformer_forward(x, params, heads=heads, dim_head=dim_head,
                              project_out=project_out)
    out = jax.block_until_ready(out)

    ref = transformer_reference(x, params, heads=heads, dim_head=dim_head,
                                project_out=project_out)
    assert out.shape == (B, N, dim)
    max_err = float(jnp.max(jnp.abs(out - ref)))
    assert jnp.allclose(out, ref, atol=2e-3, rtol=2e-3), f"max abs err {max_err}"

    print("KERNEL_OK")
</pallas_src>

<mosaic_0001>
module attributes {stable_mosaic.version = 11 : i64} {
  func.func @_linear_residual_kernel(%arg0: i32, %arg1: i32, %arg2: memref<16x32xf32, #tpu.memory_space<vmem>>, %arg3: memref<32x32xf32, #tpu.memory_space<vmem>>, %arg4: memref<1x32xf32, #tpu.memory_space<vmem>>, %arg5: memref<16x32xf32, #tpu.memory_space<vmem>>, %arg6: memref<16x32xf32, #tpu.memory_space<vmem>>) attributes {dimension_semantics = [#tpu.dimension_semantics<parallel>, #tpu.dimension_semantics<parallel>], iteration_bounds = array<i64: 1, 1>, scalar_prefetch = 0 : i64, scratch_operands = 0 : i64, tpu.core_type = #tpu.core_type<tc>, window_params = [{transform_indices = @transform_0, window_bounds = array<i64: 16, 32>}, {transform_indices = @transform_1, window_bounds = array<i64: 32, 32>}, {transform_indices = @transform_2, window_bounds = array<i64: 1, 32>}, {transform_indices = @transform_3, window_bounds = array<i64: 16, 32>}, {transform_indices = @transform_4, window_bounds = array<i64: 16, 32>}]} {
    %c0 = arith.constant 0 : index
    %c0_0 = arith.constant 0 : index
    %0 = vector.load %arg2[%c0, %c0_0] : memref<16x32xf32, #tpu.memory_space<vmem>>, vector<16x32xf32>
    %c0_1 = arith.constant 0 : index
    %c0_2 = arith.constant 0 : index
    %1 = vector.load %arg3[%c0_1, %c0_2] : memref<32x32xf32, #tpu.memory_space<vmem>>, vector<32x32xf32>
    %cst = arith.constant dense<0.000000e+00> : vector<16x32xf32>
    %2 = tpu.matmul %0, %1, %cst {dimension_numbers = #tpu.dot_dimension_numbers<[1], [0], [0], [1], [0, 0, 1, 1], [], []>} : vector<16x32xf32>, vector<32x32xf32>, vector<16x32xf32> -> vector<16x32xf32>
    %c0_3 = arith.constant 0 : index
    %c0_4 = arith.constant 0 : index
    %3 = vector.load %arg4[%c0_3, %c0_4] : memref<1x32xf32, #tpu.memory_space<vmem>>, vector<1x32xf32>
    %4 = vector.broadcast %3 : vector<1x32xf32> to vector<16x32xf32>
    %5 = arith.addf %2, %4 : vector<16x32xf32>
    %c0_5 = arith.constant 0 : index
    %c0_6 = arith.constant 0 : index
    %6 = vector.load %arg5[%c0_5, %c0_6] : memref<16x32xf32, #tpu.memory_space<vmem>>, vector<16x32xf32>
    %7 = arith.addf %5, %6 : vector<16x32xf32>
    %c0_7 = arith.constant 0 : index
    %c0_8 = arith.constant 0 : index
    %8 = vector.load %arg6[%c0_7, %c0_8] : memref<16x32xf32, #tpu.memory_space<vmem>>, vector<16x32xf32>
    tpu.vector_store %arg6[%c0_7, %c0_8], %7 {strides = array<i32>} : memref<16x32xf32, #tpu.memory_space<vmem>>, vector<16x32xf32>,
    return
  }
  func.func @transform_0(%arg0: i32, %arg1: i32) -> (i32, i32) {
    %c0_i32 = arith.constant 0 : i32
    %c0_i32_0 = arith.constant 0 : i32
    return %arg0, %c0_i32 : i32, i32
  }
  func.func @transform_1(%arg0: i32, %arg1: i32) -> (i32, i32) {
    %c0_i32 = arith.constant 0 : i32
    %c0_i32_0 = arith.constant 0 : i32
    return %c0_i32, %arg1 : i32, i32
  }
  func.func @transform_2(%arg0: i32, %arg1: i32) -> (i32, i32) {
    %c0_i32 = arith.constant 0 : i32
    %c0_i32_0 = arith.constant 0 : i32
    return %c0_i32, %arg1 : i32, i32
  }
  func.func @transform_3(%arg0: i32, %arg1: i32) -> (i32, i32) {
    %c0_i32 = arith.constant 0 : i32
    return %arg0, %arg1 : i32, i32
  }
  func.func @transform_4(%arg0: i32, %arg1: i32) -> (i32, i32) {
    %c0_i32 = arith.constant 0 : i32
    return %arg0, %arg1 : i32, i32
  }
}

module attributes {stable_mosaic.version = 11 : i64} {
  func.func @_ln_linear_kernel(%arg0: i32, %arg1: i32, %arg2: memref<16x32xf32, #tpu.memory_space<vmem>>, %arg3: memref<1x32xf32, #tpu.memory_space<vmem>>, %arg4: memref<1x32xf32, #tpu.memory_space<vmem>>, %arg5: memref<32x96xf32, #tpu.memory_space<vmem>>, %arg6: memref<1x96xf32, #tpu.memory_space<vmem>>, %arg7: memref<16x96xf32, #tpu.memory_space<vmem>>, %arg8: memref<16x32xf32, #tpu.memory_space<vmem>>) attributes {dimension_semantics = [#tpu.dimension_semantics<parallel>, #tpu.dimension_semantics<arbitrary>], iteration_bounds = array<i64: 1, 1>, scalar_prefetch = 0 : i64, scratch_operands = 1 : i64, tpu.core_type = #tpu.core_type<tc>, window_params = [{transform_indices = @transform_0, window_bounds = array<i64: 16, 32>}, {pipeline_mode = #tpu.pipeline_mode<synchronous>, transform_indices = @transform_1, window_bounds = array<i64: 1, 32>}, {pipeline_mode = #tpu.pipeline_mode<synchronous>, transform_indices = @transform_2, window_bounds = array<i64: 1, 32>}, {transform_indices = @transform_3, window_bounds = array<i64: 32, 96>}, {transform_indices = @transform_4, window_bounds = array<i64: 1, 96>}, {transform_indices = @transform_5, window_bounds = array<i64: 16, 96>}]} {
    %c0_i32 = arith.constant 0 : i32
    %0 = arith.cmpi eq, %arg1, %c0_i32 : i32
    %1 = arith.extui %0 : i1 to i32
    %c0_i32_0 = arith.constant 0 : i32
    %2 = arith.cmpi ne, %1, %c0_i32_0 : i32
    scf.if %2 {
      %c0_8 = arith.constant 0 : index
      %c0_9 = arith.constant 0 : index
      %10 = vector.load %arg2[%c0_8, %c0_9] : memref<16x32xf32, #tpu.memory_space<vmem>>, vector<16x32xf32>
      %cst_10 = arith.constant dense<0.000000e+00> : vector<16xf32>
      %11 = vector.multi_reduction <add>, %10, %cst_10 [1] : vector<16x32xf32> to vector<16xf32>
      %12 = vector.shape_cast %11 : vector<16xf32> to vector<16x1xf32>
      %cst_11 = arith.constant 3.200000e+01 : f32
      %13 = vector.broadcast %cst_11 : f32 to vector<16x1xf32>
      %14 = arith.divf %12, %13 : vector<16x1xf32>
      %15 = vector.broadcast %14 : vector<16x1xf32> to vector<16x32xf32>
      %16 = arith.subf %10, %15 : vector<16x32xf32>
      %17 = arith.mulf %16, %16 : vector<16x32xf32>
      %cst_12 = arith.constant dense<0.000000e+00> : vector<16xf32>
      %18 = vector.multi_reduction <add>, %17, %cst_12 [1] : vector<16x32xf32> to vector<16xf32>
      %19 = vector.shape_cast %18 : vector<16xf32> to vector<16x1xf32>
      %cst_13 = arith.constant 3.200000e+01 : f32
      %20 = vector.broadcast %cst_13 : f32 to vector<16x1xf32>
      %21 = arith.divf %19, %20 : vector<16x1xf32>
      %cst_14 = arith.constant 9.99999974E-6 : f32
      %22 = vector.broadcast %cst_14 : f32 to vector<16x1xf32>
      %23 = arith.addf %21, %22 : vector<16x1xf32>
      %24 = math.rsqrt %23 : vector<16x1xf32>
      %25 = vector.broadcast %24 : vector<16x1xf32> to vector<16x32xf32>
      %26 = arith.mulf %16, %25 : vector<16x32xf32>
      %c0_15 = arith.constant 0 : index
      %c0_16 = arith.constant 0 : index
      %27 = vector.load %arg3[%c0_15, %c0_16] : memref<1x32xf32, #tpu.memory_space<vmem>>, vector<1x32xf32>
      %28 = vector.broadcast %27 : vector<1x32xf32> to vector<16x32xf32>
      %29 = arith.mulf %26, %28 : vector<16x32xf32>
      %c0_17 = arith.constant 0 : index
      %c0_18 = arith.constant 0 : index
      %30 = vector.load %arg4[%c0_17, %c0_18] : memref<1x32xf32, #tpu.memory_space<vmem>>, vector<1x32xf32>
      %31 = vector.broadcast %30 : vector<1x32xf32> to vector<16x32xf32>
      %32 = arith.addf %29, %31 : vector<16x32xf32>
      %c0_19 = arith.constant 0 : index
      %c0_20 = arith.constant 0 : index
      %33 = vector.load %arg8[%c0_19, %c0_20] : memref<16x32xf32, #tpu.memory_space<vmem>>, vector<16x32xf32>
      tpu.vector_store %arg8[%c0_19, %c0_20], %32 {strides = array<i32>} : memref<16x32xf32, #tpu.memory_space<vmem>>, vector<16x32xf32>,
    } else {
    }
    %c0 = arith.constant 0 : index
    %c0_1 = arith.constant 0 : index
    %3 = vector.load %arg8[%c0, %c0_1] : memref<16x32xf32, #tpu.memory_space<vmem>>, vector<16x32xf32>
    %c0_2 = arith.constant 0 : index
    %c0_3 = arith.constant 0 : index
    %4 = vector.load %arg5[%c0_2, %c0_3] : memref<32x96xf32, #tpu.memory_space<vmem>>, vector<32x96xf32>
    %cst = arith.constant dense<0.000000e+00> : vector<16x96xf32>
    %5 = tpu.matmul %3, %4, %cst {dimension_numbers = #tpu.dot_dimension_numbers<[1], [0], [0], [1], [0, 0, 1, 1], [], []>} : vector<16x32xf32>, vector<32x96xf32>, vector<16x96xf32> -> vector<16x96xf32>
    %c0_4 = arith.constant 0 : index
    %c0_5 = arith.constant 0 : index
    %6 = vector.load %arg6[%c0_4, %c0_5] : memref<1x96xf32, #tpu.memory_space<vmem>>, vector<1x96xf32>
    %7 = vector.broadcast %6 : vector<1x96xf32> to vector<16x96xf32>
    %8 = arith.addf %5, %7 : vector<16x96xf32>
    %c0_6 = arith.constant 0 : index
    %c0_7 = arith.constant 0 : index
    %9 = vector.load %arg7[%c0_6, %c0_7] : memref<16x96xf32, #tpu.memory_space<vmem>>, vector<16x96xf32>
    tpu.vector_store %arg7[%c0_6, %c0_7], %8 {strides = array<i32>} : memref<16x96xf32, #tpu.memory_space<vmem>>, vector<16x96xf32>,
    return
  }
  func.func @transform_0(%arg0: i32, %arg1: i32) -> (i32, i32) {
    %c0_i32 = arith.constant 0 : i32
    %c0_i32_0 = arith.constant 0 : i32
    return %arg0, %c0_i32 : i32, i32
  }
  func.func @transform_1(%arg0: i32, %arg1: i32) -> (i32, i32) {
    %c0_i32 = arith.constant 0 : i32
    %c0_i32_0 = arith.constant 0 : i32
    %c0_i32_1 = arith.constant 0 : i32
    return %c0_i32, %c0_i32_0 : i32, i32
  }
  func.func @transform_2(%arg0: i32, %arg1: i32) -> (i32, i32) {
    %c0_i32 = arith.constant 0 : i32
    %c0_i32_0 = arith.constant 0 : i32
    %c0_i32_1 = arith.constant 0 : i32
    return %c0_i32, %c0_i32_0 : i32, i32
  }
  func.func @transform_3(%arg0: i32, %arg1: i32) -> (i32, i32) {
    %c0_i32 = arith.constant 0 : i32
    %c0_i32_0 = arith.constant 0 : i32
    return %c0_i32, %arg1 : i32, i32
  }
  func.func @transform_4(%arg0: i32, %arg1: i32) -> (i32, i32) {
    %c0_i32 = arith.constant 0 : i32
    %c0_i32_0 = arith.constant 0 : i32
    return %c0_i32, %arg1 : i32, i32
  }
  func.func @transform_5(%arg0: i32, %arg1: i32) -> (i32, i32) {
    %c0_i32 = arith.constant 0 : i32
    return %arg0, %arg1 : i32, i32
  }
}

module attributes {stable_mosaic.version = 11 : i64} {
  func.func @_attention_kernel(%arg0: i32, %arg1: memref<1x8x96xf32, #tpu.memory_space<vmem>>, %arg2: memref<1x8x32xf32, #tpu.memory_space<vmem>>) attributes {dimension_semantics = [#tpu.dimension_semantics<parallel>], iteration_bounds = array<i64: 2>, scalar_prefetch = 0 : i64, scratch_operands = 0 : i64, tpu.core_type = #tpu.core_type<tc>, window_params = [{transform_indices = @transform_0, window_bounds = array<i64: 1, 8, 96>}, {transform_indices = @transform_1, window_bounds = array<i64: 1, 8, 32>}]} {
    %c0 = arith.constant 0 : index
    %c0_0 = arith.constant 0 : index
    %c0_1 = arith.constant 0 : index
    %0 = vector.load %arg1[%c0, %c0_0, %c0_1] : memref<1x8x96xf32, #tpu.memory_space<vmem>>, vector<1x8x8xf32>
    %1 = vector.shape_cast %0 : vector<1x8x8xf32> to vector<8x8xf32>
    %c0_2 = arith.constant 0 : index
    %c0_3 = arith.constant 0 : index
    %c32 = arith.constant 32 : index
    %2 = vector.load %arg1[%c0_2, %c0_3, %c32] : memref<1x8x96xf32, #tpu.memory_space<vmem>>, vector<1x8x8xf32>
    %3 = vector.shape_cast %2 : vector<1x8x8xf32> to vector<8x8xf32>
    %c0_4 = arith.constant 0 : index
    %c0_5 = arith.constant 0 : index
    %c64 = arith.constant 64 : index
    %4 = vector.load %arg1[%c0_4, %c0_5, %c64] : memref<1x8x96xf32, #tpu.memory_space<vmem>>, vector<1x8x8xf32>
    %5 = vector.shape_cast %4 : vector<1x8x8xf32> to vector<8x8xf32>
    %cst = arith.constant dense<0.000000e+00> : vector<8x8xf32>
    %6 = tpu.matmul %1, %3, %cst {dimension_numbers = #tpu.dot_dimension_numbers<[1], [1], [0], [0], [0, 0, 1, 0], [], []>} : vector<8x8xf32>, vector<8x8xf32>, vector<8x8xf32> -> vector<8x8xf32>
    %cst_6 = arith.constant 0.353553385 : f32
    %7 = vector.broadcast %cst_6 : f32 to vector<8x8xf32>
    %8 = arith.mulf %6, %7 : vector<8x8xf32>
    %cst_7 = arith.constant dense<0xFF800000> : vector<8xf32>
    %9 = vector.multi_reduction <maximumf>, %8, %cst_7 [1] : vector<8x8xf32> to vector<8xf32>
    %10 = vector.shape_cast %9 : vector<8xf32> to vector<8x1xf32>
    %11 = vector.broadcast %10 : vector<8x1xf32> to vector<8x8xf32>
    %12 = arith.subf %8, %11 : vector<8x8xf32>
    %13 = math.exp %12 : vector<8x8xf32>
    %cst_8 = arith.constant dense<0.000000e+00> : vector<8xf32>
    %14 = vector.multi_reduction <add>, %13, %cst_8 [1] : vector<8x8xf32> to vector<8xf32>
    %15 = vector.shape_cast %14 : vector<8xf32> to vector<8x1xf32>
    %cst_9 = arith.constant dense<0.000000e+00> : vector<8x8xf32>
    %16 = tpu.matmul %13, %5, %cst_9 {dimension_numbers = #tpu.dot_dimension_numbers<[1], [0], [0], [1], [0, 0, 1, 1], [], []>} : vector<8x8xf32>, vector<8x8xf32>, vector<8x8xf32> -> vector<8x8xf32>
    %17 = tpu.reciprocal %15 {approx = true} : vector<8x1xf32> -> vector<8x1xf32>
    %18 = vector.broadcast %17 : vector<8x1xf32> to vector<8x8xf32>
    %19 = arith.mulf %16, %18 : vector<8x8xf32>
    %c0_10 = arith.constant 0 : index
    %c0_11 = arith.constant 0 : index
    %c0_12 = arith.constant 0 : index
    %20 = vector.load %arg2[%c0_10, %c0_11, %c0_12] : memref<1x8x32xf32, #tpu.memory_space<vmem>>, vector<1x8x8xf32>
    %21 = vector.shape_cast %20 : vector<1x8x8xf32> to vector<8x8xf32>
    %22 = vector.shape_cast %19 : vector<8x8xf32> to vector<1x8x8xf32>
    tpu.vector_store %arg2[%c0_10, %c0_11, %c0_12], %22 {strides = array<i32>} : memref<1x8x32xf32, #tpu.memory_space<vmem>>, vector<1x8x8xf32>,
    %c0_13 = arith.constant 0 : index
    %c0_14 = arith.constant 0 : index
    %c8 = arith.constant 8 : index
    %23 = vector.load %arg1[%c0_13, %c0_14, %c8] : memref<1x8x96xf32, #tpu.memory_space<vmem>>, vector<1x8x8xf32>
    %24 = vector.shape_cast %23 : vector<1x8x8xf32> to vector<8x8xf32>
    %c0_15 = arith.constant 0 : index
    %c0_16 = arith.constant 0 : index
    %c40 = arith.constant 40 : index
    %25 = vector.load %arg1[%c0_15, %c0_16, %c40] : memref<1x8x96xf32, #tpu.memory_space<vmem>>, vector<1x8x8xf32>
    %26 = vector.shape_cast %25 : vector<1x8x8xf32> to vector<8x8xf32>
    %c0_17 = arith.constant 0 : index
    %c0_18 = arith.constant 0 : index
    %c72 = arith.constant 72 : index
    %27 = vector.load %arg1[%c0_17, %c0_18, %c72] : memref<1x8x96xf32, #tpu.memory_space<vmem>>, vector<1x8x8xf32>
    %28 = vector.shape_cast %27 : vector<1x8x8xf32> to vector<8x8xf32>
    %cst_19 = arith.constant dense<0.000000e+00> : vector<8x8xf32>
    %29 = tpu.matmul %24, %26, %cst_19 {dimension_numbers = #tpu.dot_dimension_numbers<[1], [1], [0], [0], [0, 0, 1, 0], [], []>} : vector<8x8xf32>, vector<8x8xf32>, vector<8x8xf32> -> vector<8x8xf32>
    %cst_20 = arith.constant 0.353553385 : f32
    %30 = vector.broadcast %cst_20 : f32 to vector<8x8xf32>
    %31 = arith.mulf %29, %30 : vector<8x8xf32>
    %cst_21 = arith.constant dense<0xFF800000> : vector<8xf32>
    %32 = vector.multi_reduction <maximumf>, %31, %cst_21 [1] : vector<8x8xf32> to vector<8xf32>
    %33 = vector.shape_cast %32 : vector<8xf32> to vector<8x1xf32>
    %34 = vector.broadcast %33 : vector<8x1xf32> to vector<8x8xf32>
    %35 = arith.subf %31, %34 : vector<8x8xf32>
    %36 = math.exp %35 : vector<8x8xf32>
    %cst_22 = arith.constant dense<0.000000e+00> : vector<8xf32>
    %37 = vector.multi_reduction <add>, %36, %cst_22 [1] : vector<8x8xf32> to vector<8xf32>
    %38 = vector.shape_cast %37 : vector<8xf32> to vector<8x1xf32>
    %cst_23 = arith.constant dense<0.000000e+00> : vector<8x8xf32>
    %39 = tpu.matmul %36, %28, %cst_23 {dimension_numbers = #tpu.dot_dimension_numbers<[1], [0], [0], [1], [0, 0, 1, 1], [], []>} : vector<8x8xf32>, vector<8x8xf32>, vector<8x8xf32> -> vector<8x8xf32>
    %40 = tpu.reciprocal %38 {approx = true} : vector<8x1xf32> -> vector<8x1xf32>
    %41 = vector.broadcast %40 : vector<8x1xf32> to vector<8x8xf32>
    %42 = arith.mulf %39, %41 : vector<8x8xf32>
    %c0_24 = arith.constant 0 : index
    %c0_25 = arith.constant 0 : index
    %c8_26 = arith.constant 8 : index
    %43 = vector.load %arg2[%c0_24, %c0_25, %c8_26] : memref<1x8x32xf32, #tpu.memory_space<vmem>>, vector<1x8x8xf32>
    %44 = vector.shape_cast %43 : vector<1x8x8xf32> to vector<8x8xf32>
    %45 = vector.shape_cast %42 : vector<8x8xf32> to vector<1x8x8xf32>
    tpu.vector_store %arg2[%c0_24, %c0_25, %c8_26], %45 {strides = array<i32>} : memref<1x8x32xf32, #tpu.memory_space<vmem>>, vector<1x8x8xf32>,
    %c0_27 = arith.constant 0 : index
    %c0_28 = arith.constant 0 : index
    %c16 = arith.constant 16 : index
    %46 = vector.load %arg1[%c0_27, %c0_28, %c16] : memref<1x8x96xf32, #tpu.memory_space<vmem>>, vector<1x8x8xf32>
    %47 = vector.shape_cast %46 : vector<1x8x8xf32> to vector<8x8xf32>
    %c0_29 = arith.constant 0 : index
    %c0_30 = arith.constant 0 : index
    %c48 = arith.constant 48 : index
    %48 = vector.load %arg1[%c0_29, %c0_30, %c48] : memref<1x8x96xf32, #tpu.memory_space<vmem>>, vector<1x8x8xf32>
    %49 = vector.shape_cast %48 : vector<1x8x8xf32> to vector<8x8xf32>
    %c0_31 = arith.constant 0 : index
    %c0_32 = arith.constant 0 : index
    %c80 = arith.constant 80 : index
    %50 = vector.load %arg1[%c0_31, %c0_32, %c80] : memref<1x8x96xf32, #tpu.memory_space<vmem>>, vector<1x8x8xf32>
    %51 = vector.shape_cast %50 : vector<1x8x8xf32> to vector<8x8xf32>
    %cst_33 = arith.constant dense<0.000000e+00> : vector<8x8xf32>
    %52 = tpu.matmul %47, %49, %cst_33 {dimension_numbers = #tpu.dot_dimension_numbers<[1], [1], [0], [0], [0, 0, 1, 0], [], []>} : vector<8x8xf32>, vector<8x8xf32>, vector<8x8xf32> -> vector<8x8xf32>
    %cst_34 = arith.constant 0.353553385 : f32
    %53 = vector.broadcast %cst_34 : f32 to vector<8x8xf32>
    %54 = arith.mulf %52, %53 : vector<8x8xf32>
    %cst_35 = arith.constant dense<0xFF800000> : vector<8xf32>
    %55 = vector.multi_reduction <maximumf>, %54, %cst_35 [1] : vector<8x8xf32> to vector<8xf32>
    %56 = vector.shape_cast %55 : vector<8xf32> to vector<8x1xf32>
    %57 = vector.broadcast %56 : vector<8x1xf32> to vector<8x8xf32>
    %58 = arith.subf %54, %57 : vector<8x8xf32>
    %59 = math.exp %58 : vector<8x8xf32>
    %cst_36 = arith.constant dense<0.000000e+00> : vector<8xf32>
    %60 = vector.multi_reduction <add>, %59, %cst_36 [1] : vector<8x8xf32> to vector<8xf32>
    %61 = vector.shape_cast %60 : vector<8xf32> to vector<8x1xf32>
    %cst_37 = arith.constant dense<0.000000e+00> : vector<8x8xf32>
    %62 = tpu.matmul %59, %51, %cst_37 {dimension_numbers = #tpu.dot_dimension_numbers<[1], [0], [0], [1], [0, 0, 1, 1], [], []>} : vector<8x8xf32>, vector<8x8xf32>, vector<8x8xf32> -> vector<8x8xf32>
    %63 = tpu.reciprocal %61 {approx = true} : vector<8x1xf32> -> vector<8x1xf32>
    %64 = vector.broadcast %63 : vector<8x1xf32> to vector<8x8xf32>
    %65 = arith.mulf %62, %64 : vector<8x8xf32>
    %c0_38 = arith.constant 0 : index
    %c0_39 = arith.constant 0 : index
    %c16_40 = arith.constant 16 : index
    %66 = vector.load %arg2[%c0_38, %c0_39, %c16_40] : memref<1x8x32xf32, #tpu.memory_space<vmem>>, vector<1x8x8xf32>
    %67 = vector.shape_cast %66 : vector<1x8x8xf32> to vector<8x8xf32>
    %68 = vector.shape_cast %65 : vector<8x8xf32> to vector<1x8x8xf32>
    tpu.vector_store %arg2[%c0_38, %c0_39, %c16_40], %68 {strides = array<i32>} : memref<1x8x32xf32, #tpu.memory_space<vmem>>, vector<1x8x8xf32>,
    %c0_41 = arith.constant 0 : index
    %c0_42 = arith.constant 0 : index
    %c24 = arith.constant 24 : index
    %69 = vector.load %arg1[%c0_41, %c0_42, %c24] : memref<1x8x96xf32, #tpu.memory_space<vmem>>, vector<1x8x8xf32>
    %70 = vector.shape_cast %69 : vector<1x8x8xf32> to vector<8x8xf32>
    %c0_43 = arith.constant 0 : index
    %c0_44 = arith.constant 0 : index
    %c56 = arith.constant 56 : index
    %71 = vector.load %arg1[%c0_43, %c0_44, %c56] : memref<1x8x96xf32, #tpu.memory_space<vmem>>, vector<1x8x8xf32>
    %72 = vector.shape_cast %71 : vector<1x8x8xf32> to vector<8x8xf32>
    %c0_45 = arith.constant 0 : index
    %c0_46 = arith.constant 0 : index
    %c88 = arith.constant 88 : index
    %73 = vector.load %arg1[%c0_45, %c0_46, %c88] : memref<1x8x96xf32, #tpu.memory_space<vmem>>, vector<1x8x8xf32>
    %74 = vector.shape_cast %73 : vector<1x8x8xf32> to vector<8x8xf32>
    %cst_47 = arith.constant dense<0.000000e+00> : vector<8x8xf32>
    %75 = tpu.matmul %70, %72, %cst_47 {dimension_numbers = #tpu.dot_dimension_numbers<[1], [1], [0], [0], [0, 0, 1, 0], [], []>} : vector<8x8xf32>, vector<8x8xf32>, vector<8x8xf32> -> vector<8x8xf32>
    %cst_48 = arith.constant 0.353553385 : f32
    %76 = vector.broadcast %cst_48 : f32 to vector<8x8xf32>
    %77 = arith.mulf %75, %76 : vector<8x8xf32>
    %cst_49 = arith.constant dense<0xFF800000> : vector<8xf32>
    %78 = vector.multi_reduction <maximumf>, %77, %cst_49 [1] : vector<8x8xf32> to vector<8xf32>
    %79 = vector.shape_cast %78 : vector<8xf32> to vector<8x1xf32>
    %80 = vector.broadcast %79 : vector<8x1xf32> to vector<8x8xf32>
    %81 = arith.subf %77, %80 : vector<8x8xf32>
    %82 = math.exp %81 : vector<8x8xf32>
    %cst_50 = arith.constant dense<0.000000e+00> : vector<8xf32>
    %83 = vector.multi_reduction <add>, %82, %cst_50 [1] : vector<8x8xf32> to vector<8xf32>
    %84 = vector.shape_cast %83 : vector<8xf32> to vector<8x1xf32>
    %cst_51 = arith.constant dense<0.000000e+00> : vector<8x8xf32>
    %85 = tpu.matmul %82, %74, %cst_51 {dimension_numbers = #tpu.dot_dimension_numbers<[1], [0], [0], [1], [0, 0, 1, 1], [], []>} : vector<8x8xf32>, vector<8x8xf32>, vector<8x8xf32> -> vector<8x8xf32>
    %86 = tpu.reciprocal %84 {approx = true} : vector<8x1xf32> -> vector<8x1xf32>
    %87 = vector.broadcast %86 : vector<8x1xf32> to vector<8x8xf32>
    %88 = arith.mulf %85, %87 : vector<8x8xf32>
    %c0_52 = arith.constant 0 : index
    %c0_53 = arith.constant 0 : index
    %c24_54 = arith.constant 24 : index
    %89 = vector.load %arg2[%c0_52, %c0_53, %c24_54] : memref<1x8x32xf32, #tpu.memory_space<vmem>>, vector<1x8x8xf32>
    %90 = vector.shape_cast %89 : vector<1x8x8xf32> to vector<8x8xf32>
    %91 = vector.shape_cast %88 : vector<8x8xf32> to vector<1x8x8xf32>
    tpu.vector_store %arg2[%c0_52, %c0_53, %c24_54], %91 {strides = array<i32>} : memref<1x8x32xf32, #tpu.memory_space<vmem>>, vector<1x8x8xf32>,
    return
  }
  func.func @transform_0(%arg0: i32) -> (i32, i32, i32) {
    %c0_i32 = arith.constant 0 : i32
    %c0_i32_0 = arith.constant 0 : i32
    %c0_i32_1 = arith.constant 0 : i32
    return %arg0, %c0_i32, %c0_i32_0 : i32, i32, i32
  }
  func.func @transform_1(%arg0: i32) -> (i32, i32, i32) {
    %c0_i32 = arith.constant 0 : i32
    %c0_i32_0 = arith.constant 0 : i32
    %c0_i32_1 = arith.constant 0 : i32
    return %arg0, %c0_i32, %c0_i32_0 : i32, i32, i32
  }
}

module attributes {stable_mosaic.version = 11 : i64} {
  func.func @_ln_linear_kernel(%arg0: i32, %arg1: i32, %arg2: memref<16x32xf32, #tpu.memory_space<vmem>>, %arg3: memref<1x32xf32, #tpu.memory_space<vmem>>, %arg4: memref<1x32xf32, #tpu.memory_space<vmem>>, %arg5: memref<32x64xf32, #tpu.memory_space<vmem>>, %arg6: memref<1x64xf32, #tpu.memory_space<vmem>>, %arg7: memref<16x64xf32, #tpu.memory_space<vmem>>, %arg8: memref<16x32xf32, #tpu.memory_space<vmem>>) attributes {dimension_semantics = [#tpu.dimension_semantics<parallel>, #tpu.dimension_semantics<arbitrary>], iteration_bounds = array<i64: 1, 1>, scalar_prefetch = 0 : i64, scratch_operands = 1 : i64, tpu.core_type = #tpu.core_type<tc>, window_params = [{transform_indices = @transform_0, window_bounds = array<i64: 16, 32>}, {pipeline_mode = #tpu.pipeline_mode<synchronous>, transform_indices = @transform_1, window_bounds = array<i64: 1, 32>}, {pipeline_mode = #tpu.pipeline_mode<synchronous>, transform_indices = @transform_2, window_bounds = array<i64: 1, 32>}, {transform_indices = @transform_3, window_bounds = array<i64: 32, 64>}, {transform_indices = @transform_4, window_bounds = array<i64: 1, 64>}, {transform_indices = @transform_5, window_bounds = array<i64: 16, 64>}]} {
    %c0_i32 = arith.constant 0 : i32
    %0 = arith.cmpi eq, %arg1, %c0_i32 : i32
    %1 = arith.extui %0 : i1 to i32
    %c0_i32_0 = arith.constant 0 : i32
    %2 = arith.cmpi ne, %1, %c0_i32_0 : i32
    scf.if %2 {
      %c0_23 = arith.constant 0 : index
      %c0_24 = arith.constant 0 : index
      %50 = vector.load %arg2[%c0_23, %c0_24] : memref<16x32xf32, #tpu.memory_space<vmem>>, vector<16x32xf32>
      %cst_25 = arith.constant dense<0.000000e+00> : vector<16xf32>
      %51 = vector.multi_reduction <add>, %50, %cst_25 [1] : vector<16x32xf32> to vector<16xf32>
      %52 = vector.shape_cast %51 : vector<16xf32> to vector<16x1xf32>
      %cst_26 = arith.constant 3.200000e+01 : f32
      %53 = vector.broadcast %cst_26 : f32 to vector<16x1xf32>
      %54 = arith.divf %52, %53 : vector<16x1xf32>
      %55 = vector.broadcast %54 : vector<16x1xf32> to vector<16x32xf32>
      %56 = arith.subf %50, %55 : vector<16x32xf32>
      %57 = arith.mulf %56, %56 : vector<16x32xf32>
      %cst_27 = arith.constant dense<0.000000e+00> : vector<16xf32>
      %58 = vector.multi_reduction <add>, %57, %cst_27 [1] : vector<16x32xf32> to vector<16xf32>
      %59 = vector.shape_cast %58 : vector<16xf32> to vector<16x1xf32>
      %cst_28 = arith.constant 3.200000e+01 : f32
      %60 = vector.broadcast %cst_28 : f32 to vector<16x1xf32>
      %61 = arith.divf %59, %60 : vector<16x1xf32>
      %cst_29 = arith.constant 9.99999974E-6 : f32
      %62 = vector.broadcast %cst_29 : f32 to vector<16x1xf32>
      %63 = arith.addf %61, %62 : vector<16x1xf32>
      %64 = math.rsqrt %63 : vector<16x1xf32>
      %65 = vector.broadcast %64 : vector<16x1xf32> to vector<16x32xf32>
      %66 = arith.mulf %56, %65 : vector<16x32xf32>
      %c0_30 = arith.constant 0 : index
      %c0_31 = arith.constant 0 : index
      %67 = vector.load %arg3[%c0_30, %c0_31] : memref<1x32xf32, #tpu.memory_space<vmem>>, vector<1x32xf32>
      %68 = vector.broadcast %67 : vector<1x32xf32> to vector<16x32xf32>
      %69 = arith.mulf %66, %68 : vector<16x32xf32>
      %c0_32 = arith.constant 0 : index
      %c0_33 = arith.constant 0 : index
      %70 = vector.load %arg4[%c0_32, %c0_33] : memref<1x32xf32, #tpu.memory_space<vmem>>, vector<1x32xf32>
      %71 = vector.broadcast %70 : vector<1x32xf32> to vector<16x32xf32>
      %72 = arith.addf %69, %71 : vector<16x32xf32>
      %c0_34 = arith.constant 0 : index
      %c0_35 = arith.constant 0 : index
      %73 = vector.load %arg8[%c0_34, %c0_35] : memref<16x32xf32, #tpu.memory_space<vmem>>, vector<16x32xf32>
      tpu.vector_store %arg8[%c0_34, %c0_35], %72 {strides = array<i32>} : memref<16x32xf32, #tpu.memory_space<vmem>>, vector<16x32xf32>,
    } else {
    }
    %c0 = arith.constant 0 : index
    %c0_1 = arith.constant 0 : index
    %3 = vector.load %arg8[%c0, %c0_1] : memref<16x32xf32, #tpu.memory_space<vmem>>, vector<16x32xf32>
    %c0_2 = arith.constant 0 : index
    %c0_3 = arith.constant 0 : index
    %4 = vector.load %arg5[%c0_2, %c0_3] : memref<32x64xf32, #tpu.memory_space<vmem>>, vector<32x64xf32>
    %cst = arith.constant dense<0.000000e+00> : vector<16x64xf32>
    %5 = tpu.matmul %3, %4, %cst {dimension_numbers = #tpu.dot_dimension_numbers<[1], [0], [0], [1], [0, 0, 1, 1], [], []>} : vector<16x32xf32>, vector<32x64xf32>, vector<16x64xf32> -> vector<16x64xf32>
    %c0_4 = arith.constant 0 : index
    %c0_5 = arith.constant 0 : index
    %6 = vector.load %arg6[%c0_4, %c0_5] : memref<1x64xf32, #tpu.memory_space<vmem>>, vector<1x64xf32>
    %7 = vector.broadcast %6 : vector<1x64xf32> to vector<16x64xf32>
    %8 = arith.addf %5, %7 : vector<16x64xf32>
    %cst_6 = arith.constant 5.000000e-01 : f32
    %9 = vector.broadcast %cst_6 : f32 to vector<16x64xf32>
    %10 = arith.mulf %9, %8 : vector<16x64xf32>
    %cst_7 = arith.constant 0.707106769 : f32
    %11 = vector.broadcast %cst_7 : f32 to vector<16x64xf32>
    %12 = arith.mulf %8, %11 : vector<16x64xf32>
    %cst_8 = arith.constant 0.000000e+00 : f32
    %13 = vector.broadcast %cst_8 : f32 to vector<16x64xf32>
    %14 = arith.cmpf oge, %12, %13 : vector<16x64xf32>
    %cst_9 = arith.constant 1.000000e+00 : f32
    %cst_10 = arith.constant -1.000000e+00 : f32
    %15 = vector.broadcast %cst_9 : f32 to vector<16x64xf32>
    %16 = vector.broadcast %cst_10 : f32 to vector<16x64xf32>
    %17 = arith.select %14, %15, %16 : vector<16x64xi1>, vector<16x64xf32>
    %18 = math.absf %12 : vector<16x64xf32>
    %cst_11 = arith.constant 0.327591091 : f32
    %19 = vector.broadcast %cst_11 : f32 to vector<16x64xf32>
    %20 = arith.mulf %19, %18 : vector<16x64xf32>
    %cst_12 = arith.constant 1.000000e+00 : f32
    %21 = vector.broadcast %cst_12 : f32 to vector<16x64xf32>
    %22 = arith.addf %21, %20 : vector<16x64xf32>
    %23 = tpu.reciprocal %22 {approx = true} : vector<16x64xf32> -> vector<16x64xf32>
    %cst_13 = arith.constant 1.06140542 : f32
    %24 = vector.broadcast %cst_13 : f32 to vector<16x64xf32>
    %25 = arith.mulf %23, %24 : vector<16x64xf32>
    %cst_14 = arith.constant -1.45315206 : f32
    %26 = vector.broadcast %cst_14 : f32 to vector<16x64xf32>
    %27 = arith.addf %26, %25 : vector<16x64xf32>
    %28 = arith.mulf %23, %27 : vector<16x64xf32>
    %cst_15 = arith.constant 1.42141378 : f32
    %29 = vector.broadcast %cst_15 : f32 to vector<16x64xf32>
    %30 = arith.addf %29, %28 : vector<16x64xf32>
    %31 = arith.mulf %23, %30 : vector<16x64xf32>
    %cst_16 = arith.constant -0.284496725 : f32
    %32 = vector.broadcast %cst_16 : f32 to vector<16x64xf32>
    %33 = arith.addf %32, %31 : vector<16x64xf32>
    %34 = arith.mulf %23, %33 : vector<16x64xf32>
    %cst_17 = arith.constant 0.254829586 : f32
    %35 = vector.broadcast %cst_17 : f32 to vector<16x64xf32>
    %36 = arith.addf %35, %34 : vector<16x64xf32>
    %37 = arith.mulf %23, %36 : vector<16x64xf32>
    %cst_18 = arith.constant 0.000000e+00 : f32
    %38 = vector.broadcast %cst_18 : f32 to vector<16x64xf32>
    %39 = arith.subf %38, %18 : vector<16x64xf32>
    %40 = arith.mulf %39, %18 : vector<16x64xf32>
    %41 = math.exp %40 : vector<16x64xf32>
    %42 = arith.mulf %37, %41 : vector<16x64xf32>
    %cst_19 = arith.constant 1.000000e+00 : f32
    %43 = vector.broadcast %cst_19 : f32 to vector<16x64xf32>
    %44 = arith.subf %43, %42 : vector<16x64xf32>
    %45 = arith.mulf %17, %44 : vector<16x64xf32>
    %cst_20 = arith.constant 1.000000e+00 : f32
    %46 = vector.broadcast %cst_20 : f32 to vector<16x64xf32>
    %47 = arith.addf %46, %45 : vector<16x64xf32>
    %48 = arith.mulf %10, %47 : vector<16x64xf32>
    %c0_21 = arith.constant 0 : index
    %c0_22 = arith.constant 0 : index
    %49 = vector.load %arg7[%c0_21, %c0_22] : memref<16x64xf32, #tpu.memory_space<vmem>>, vector<16x64xf32>
    tpu.vector_store %arg7[%c0_21, %c0_22], %48 {strides = array<i32>} : memref<16x64xf32, #tpu.memory_space<vmem>>, vector<16x64xf32>,
    return
  }
  func.func @transform_0(%arg0: i32, %arg1: i32) -> (i32, i32) {
    %c0_i32 = arith.constant 0 : i32
    %c0_i32_0 = arith.constant 0 : i32
    return %arg0, %c0_i32 : i32, i32
  }
  func.func @transform_1(%arg0: i32, %arg1: i32) -> (i32, i32) {
    %c0_i32 = arith.constant 0 : i32
    %c0_i32_0 = arith.constant 0 : i32
    %c0_i32_1 = arith.constant 0 : i32
    return %c0_i32, %c0_i32_0 : i32, i32
  }
  func.func @transform_2(%arg0: i32, %arg1: i32) -> (i32, i32) {
    %c0_i32 = arith.constant 0 : i32
    %c0_i32_0 = arith.constant 0 : i32
    %c0_i32_1 = arith.constant 0 : i32
    return %c0_i32, %c0_i32_0 : i32, i32
  }
  func.func @transform_3(%arg0: i32, %arg1: i32) -> (i32, i32) {
    %c0_i32 = arith.constant 0 : i32
    %c0_i32_0 = arith.constant 0 : i32
    return %c0_i32, %arg1 : i32, i32
  }
  func.func @transform_4(%arg0: i32, %arg1: i32) -> (i32, i32) {
    %c0_i32 = arith.constant 0 : i32
    %c0_i32_0 = arith.constant 0 : i32
    return %c0_i32, %arg1 : i32, i32
  }
  func.func @transform_5(%arg0: i32, %arg1: i32) -> (i32, i32) {
    %c0_i32 = arith.constant 0 : i32
    return %arg0, %arg1 : i32, i32
  }
}

module attributes {stable_mosaic.version = 11 : i64} {
  func.func @_linear_residual_kernel(%arg0: i32, %arg1: i32, %arg2: memref<16x64xf32, #tpu.memory_space<vmem>>, %arg3: memref<64x32xf32, #tpu.memory_space<vmem>>, %arg4: memref<1x32xf32, #tpu.memory_space<vmem>>, %arg5: memref<16x32xf32, #tpu.memory_space<vmem>>, %arg6: memref<16x32xf32, #tpu.memory_space<vmem>>) attributes {dimension_semantics = [#tpu.dimension_semantics<parallel>, #tpu.dimension_semantics<parallel>], iteration_bounds = array<i64: 1, 1>, scalar_prefetch = 0 : i64, scratch_operands = 0 : i64, tpu.core_type = #tpu.core_type<tc>, window_params = [{transform_indices = @transform_0, window_bounds = array<i64: 16, 64>}, {transform_indices = @transform_1, window_bounds = array<i64: 64, 32>}, {transform_indices = @transform_2, window_bounds = array<i64: 1, 32>}, {transform_indices = @transform_3, window_bounds = array<i64: 16, 32>}, {transform_indices = @transform_4, window_bounds = array<i64: 16, 32>}]} {
    %c0 = arith.constant 0 : index
    %c0_0 = arith.constant 0 : index
    %0 = vector.load %arg2[%c0, %c0_0] : memref<16x64xf32, #tpu.memory_space<vmem>>, vector<16x64xf32>
    %c0_1 = arith.constant 0 : index
    %c0_2 = arith.constant 0 : index
    %1 = vector.load %arg3[%c0_1, %c0_2] : memref<64x32xf32, #tpu.memory_space<vmem>>, vector<64x32xf32>
    %cst = arith.constant dense<0.000000e+00> : vector<16x32xf32>
    %2 = tpu.matmul %0, %1, %cst {dimension_numbers = #tpu.dot_dimension_numbers<[1], [0], [0], [1], [0, 0, 1, 1], [], []>} : vector<16x64xf32>, vector<64x32xf32>, vector<16x32xf32> -> vector<16x32xf32>
    %c0_3 = arith.constant 0 : index
    %c0_4 = arith.constant 0 : index
    %3 = vector.load %arg4[%c0_3, %c0_4] : memref<1x32xf32, #tpu.memory_space<vmem>>, vector<1x32xf32>
    %4 = vector.broadcast %3 : vector<1x32xf32> to vector<16x32xf32>
    %5 = arith.addf %2, %4 : vector<16x32xf32>
    %c0_5 = arith.constant 0 : index
    %c0_6 = arith.constant 0 : index
    %6 = vector.load %arg5[%c0_5, %c0_6] : memref<16x32xf32, #tpu.memory_space<vmem>>, vector<16x32xf32>
    %7 = arith.addf %5, %6 : vector<16x32xf32>
    %c0_7 = arith.constant 0 : index
    %c0_8 = arith.constant 0 : index
    %8 = vector.load %arg6[%c0_7, %c0_8] : memref<16x32xf32, #tpu.memory_space<vmem>>, vector<16x32xf32>
    tpu.vector_store %arg6[%c0_7, %c0_8], %7 {strides = array<i32>} : memref<16x32xf32, #tpu.memory_space<vmem>>, vector<16x32xf32>,
    return
  }
  func.func @transform_0(%arg0: i32, %arg1: i32) -> (i32, i32) {
    %c0_i32 = arith.constant 0 : i32
    %c0_i32_0 = arith.constant 0 : i32
    return %arg0, %c0_i32 : i32, i32
  }
  func.func @transform_1(%arg0: i32, %arg1: i32) -> (i32, i32) {
    %c0_i32 = arith.constant 0 : i32
    %c0_i32_0 = arith.constant 0 : i32
    return %c0_i32, %arg1 : i32, i32
  }
  func.func @transform_2(%arg0: i32, %arg1: i32) -> (i32, i32) {
    %c0_i32 = arith.constant 0 : i32
    %c0_i32_0 = arith.constant 0 : i32
    return %c0_i32, %arg1 : i32, i32
  }
  func.func @transform_3(%arg0: i32, %arg1: i32) -> (i32, i32) {
    %c0_i32 = arith.constant 0 : i32
    return %arg0, %arg1 : i32, i32
  }
  func.func @transform_4(%arg0: i32, %arg1: i32) -> (i32, i32) {
    %c0_i32 = arith.constant 0 : i32
    return %arg0, %arg1 : i32, i32
  }
}

module attributes {stable_mosaic.version = 11 : i64} {
  func.func @_ln_linear_kernel(%arg0: i32, %arg1: i32, %arg2: memref<16x32xf32, #tpu.memory_space<vmem>>, %arg3: memref<1x32xf32, #tpu.memory_space<vmem>>, %arg4: memref<1x32xf32, #tpu.memory_space<vmem>>, %arg5: memref<32x96xf32, #tpu.memory_space<vmem>>, %arg6: memref<1x96xf32, #tpu.memory_space<vmem>>, %arg7: memref<16x96xf32, #tpu.memory_space<vmem>>, %arg8: memref<16x32xf32, #tpu.memory_space<vmem>>) attributes {dimension_semantics = [#tpu.dimension_semantics<parallel>, #tpu.dimension_semantics<arbitrary>], iteration_bounds = array<i64: 1, 1>, scalar_prefetch = 0 : i64, scratch_operands = 1 : i64, tpu.core_type = #tpu.core_type<tc>, window_params = [{transform_indices = @transform_0, window_bounds = array<i64: 16, 32>}, {pipeline_mode = #tpu.pipeline_mode<synchronous>, transform_indices = @transform_1, window_bounds = array<i64: 1, 32>}, {pipeline_mode = #tpu.pipeline_mode<synchronous>, transform_indices = @transform_2, window_bounds = array<i64: 1, 32>}, {transform_indices = @transform_3, window_bounds = array<i64: 32, 96>}, {transform_indices = @transform_4, window_bounds = array<i64: 1, 96>}, {transform_indices = @transform_5, window_bounds = array<i64: 16, 96>}]} {
    %c0_i32 = arith.constant 0 : i32
    %0 = arith.cmpi eq, %arg1, %c0_i32 : i32
    %1 = arith.extui %0 : i1 to i32
    %c0_i32_0 = arith.constant 0 : i32
    %2 = arith.cmpi ne, %1, %c0_i32_0 : i32
    scf.if %2 {
      %c0_8 = arith.constant 0 : index
      %c0_9 = arith.constant 0 : index
      %10 = vector.load %arg2[%c0_8, %c0_9] : memref<16x32xf32, #tpu.memory_space<vmem>>, vector<16x32xf32>
      %cst_10 = arith.constant dense<0.000000e+00> : vector<16xf32>
      %11 = vector.multi_reduction <add>, %10, %cst_10 [1] : vector<16x32xf32> to vector<16xf32>
      %12 = vector.shape_cast %11 : vector<16xf32> to vector<16x1xf32>
      %cst_11 = arith.constant 3.200000e+01 : f32
      %13 = vector.broadcast %cst_11 : f32 to vector<16x1xf32>
      %14 = arith.divf %12, %13 : vector<16x1xf32>
      %15 = vector.broadcast %14 : vector<16x1xf32> to vector<16x32xf32>
      %16 = arith.subf %10, %15 : vector<16x32xf32>
      %17 = arith.mulf %16, %16 : vector<16x32xf32>
      %cst_12 = arith.constant dense<0.000000e+00> : vector<16xf32>
      %18 = vector.multi_reduction <add>, %17, %cst_12 [1] : vector<16x32xf32> to vector<16xf32>
      %19 = vector.shape_cast %18 : vector<16xf32> to vector<16x1xf32>
      %cst_13 = arith.constant 3.200000e+01 : f32
      %20 = vector.broadcast %cst_13 : f32 to vector<16x1xf32>
      %21 = arith.divf %19, %20 : vector<16x1xf32>
      %cst_14 = arith.constant 9.99999974E-6 : f32
      %22 = vector.broadcast %cst_14 : f32 to vector<16x1xf32>
      %23 = arith.addf %21, %22 : vector<16x1xf32>
      %24 = math.rsqrt %23 : vector<16x1xf32>
      %25 = vector.broadcast %24 : vector<16x1xf32> to vector<16x32xf32>
      %26 = arith.mulf %16, %25 : vector<16x32xf32>
      %c0_15 = arith.constant 0 : index
      %c0_16 = arith.constant 0 : index
      %27 = vector.load %arg3[%c0_15, %c0_16] : memref<1x32xf32, #tpu.memory_space<vmem>>, vector<1x32xf32>
      %28 = vector.broadcast %27 : vector<1x32xf32> to vector<16x32xf32>
      %29 = arith.mulf %26, %28 : vector<16x32xf32>
      %c0_17 = arith.constant 0 : index
      %c0_18 = arith.constant 0 : index
      %30 = vector.load %arg4[%c0_17, %c0_18] : memref<1x32xf32, #tpu.memory_space<vmem>>, vector<1x32xf32>
      %31 = vector.broadcast %30 : vector<1x32xf32> to vector<16x32xf32>
      %32 = arith.addf %29, %31 : vector<16x32xf32>
      %c0_19 = arith.constant 0 : index
      %c0_20 = arith.constant 0 : index
      %33 = vector.load %arg8[%c0_19, %c0_20] : memref<16x32xf32, #tpu.memory_space<vmem>>, vector<16x32xf32>
      tpu.vector_store %arg8[%c0_19, %c0_20], %32 {strides = array<i32>} : memref<16x32xf32, #tpu.memory_space<vmem>>, vector<16x32xf32>,
    } else {
    }
    %c0 = arith.constant 0 : index
    %c0_1 = arith.constant 0 : index
    %3 = vector.load %arg8[%c0, %c0_1] : memref<16x32xf32, #tpu.memory_space<vmem>>, vector<16x32xf32>
    %c0_2 = arith.constant 0 : index
    %c0_3 = arith.constant 0 : index
    %4 = vector.load %arg5[%c0_2, %c0_3] : memref<32x96xf32, #tpu.memory_space<vmem>>, vector<32x96xf32>
    %cst = arith.constant dense<0.000000e+00> : vector<16x96xf32>
    %5 = tpu.matmul %3, %4, %cst {dimension_numbers = #tpu.dot_dimension_numbers<[1], [0], [0], [1], [0, 0, 1, 1], [], []>} : vector<16x32xf32>, vector<32x96xf32>, vector<16x96xf32> -> vector<16x96xf32>
    %c0_4 = arith.constant 0 : index
    %c0_5 = arith.constant 0 : index
    %6 = vector.load %arg6[%c0_4, %c0_5] : memref<1x96xf32, #tpu.memory_space<vmem>>, vector<1x96xf32>
    %7 = vector.broadcast %6 : vector<1x96xf32> to vector<16x96xf32>
    %8 = arith.addf %5, %7 : vector<16x96xf32>
    %c0_6 = arith.constant 0 : index
    %c0_7 = arith.constant 0 : index
    %9 = vector.load %arg7[%c0_6, %c0_7] : memref<16x96xf32, #tpu.memory_space<vmem>>, vector<16x96xf32>
    tpu.vector_store %arg7[%c0_6, %c0_7], %8 {strides = array<i32>} : memref<16x96xf32, #tpu.memory_space<vmem>>, vector<16x96xf32>,
    return
  }
  func.func @transform_0(%arg0: i32, %arg1: i32) -> (i32, i32) {
    %c0_i32 = arith.constant 0 : i32
    %c0_i32_0 = arith.constant 0 : i32
    return %arg0, %c0_i32 : i32, i32
  }
  func.func @transform_1(%arg0: i32, %arg1: i32) -> (i32, i32) {
    %c0_i32 = arith.constant 0 : i32
    %c0_i32_0 = arith.constant 0 : i32
    %c0_i32_1 = arith.constant 0 : i32
    return %c0_i32, %c0_i32_0 : i32, i32
  }
  func.func @transform_2(%arg0: i32, %arg1: i32) -> (i32, i32) {
    %c0_i32 = arith.constant 0 : i32
    %c0_i32_0 = arith.constant 0 : i32
    %c0_i32_1 = arith.constant 0 : i32
    return %c0_i32, %c0_i32_0 : i32, i32
  }
  func.func @transform_3(%arg0: i32, %arg1: i32) -> (i32, i32) {
    %c0_i32 = arith.constant 0 : i32
    %c0_i32_0 = arith.constant 0 : i32
    return %c0_i32, %arg1 : i32, i32
  }
  func.func @transform_4(%arg0: i32, %arg1: i32) -> (i32, i32) {
    %c0_i32 = arith.constant 0 : i32
    %c0_i32_0 = arith.constant 0 : i32
    return %c0_i32, %arg1 : i32, i32
  }
  func.func @transform_5(%arg0: i32, %arg1: i32) -> (i32, i32) {
    %c0_i32 = arith.constant 0 : i32
    return %arg0, %arg1 : i32, i32
  }
}

module attributes {stable_mosaic.version = 11 : i64} {
  func.func @_linear_residual_kernel(%arg0: i32, %arg1: i32, %arg2: memref<16x64xf32, #tpu.memory_space<vmem>>, %arg3: memref<64x32xf32, #tpu.memory_space<vmem>>, %arg4: memref<1x32xf32, #tpu.memory_space<vmem>>, %arg5: memref<16x32xf32, #tpu.memory_space<vmem>>, %arg6: memref<16x32xf32, #tpu.memory_space<vmem>>) attributes {dimension_semantics = [#tpu.dimension_semantics<parallel>, #tpu.dimension_semantics<parallel>], iteration_bounds = array<i64: 1, 1>, scalar_prefetch = 0 : i64, scratch_operands = 0 : i64, tpu.core_type = #tpu.core_type<tc>, window_params = [{transform_indices = @transform_0, window_bounds = array<i64: 16, 64>}, {transform_indices = @transform_1, window_bounds = array<i64: 64, 32>}, {transform_indices = @transform_2, window_bounds = array<i64: 1, 32>}, {transform_indices = @transform_3, window_bounds = array<i64: 16, 32>}, {transform_indices = @transform_4, window_bounds = array<i64: 16, 32>}]} {
    %c0 = arith.constant 0 : index
    %c0_0 = arith.constant 0 : index
    %0 = vector.load %arg2[%c0, %c0_0] : memref<16x64xf32, #tpu.memory_space<vmem>>, vector<16x64xf32>
    %c0_1 = arith.constant 0 : index
    %c0_2 = arith.constant 0 : index
    %1 = vector.load %arg3[%c0_1, %c0_2] : memref<64x32xf32, #tpu.memory_space<vmem>>, vector<64x32xf32>
    %cst = arith.constant dense<0.000000e+00> : vector<16x32xf32>
    %2 = tpu.matmul %0, %1, %cst {dimension_numbers = #tpu.dot_dimension_numbers<[1], [0], [0], [1], [0, 0, 1, 1], [], []>} : vector<16x64xf32>, vector<64x32xf32>, vector<16x32xf32> -> vector<16x32xf32>
    %c0_3 = arith.constant 0 : index
    %c0_4 = arith.constant 0 : index
    %3 = vector.load %arg4[%c0_3, %c0_4] : memref<1x32xf32, #tpu.memory_space<vmem>>, vector<1x32xf32>
    %4 = vector.broadcast %3 : vector<1x32xf32> to vector<16x32xf32>
    %5 = arith.addf %2, %4 : vector<16x32xf32>
    %c0_5 = arith.constant 0 : index
    %c0_6 = arith.constant 0 : index
    %6 = vector.load %arg5[%c0_5, %c0_6] : memref<16x32xf32, #tpu.memory_space<vmem>>, vector<16x32xf32>
    %7 = arith.addf %5, %6 : vector<16x32xf32>
    %c0_7 = arith.constant 0 : index
    %c0_8 = arith.constant 0 : index
    %8 = vector.load %arg6[%c0_7, %c0_8] : memref<16x32xf32, #tpu.memory_space<vmem>>, vector<16x32xf32>
    tpu.vector_store %arg6[%c0_7, %c0_8], %7 {strides = array<i32>} : memref<16x32xf32, #tpu.memory_space<vmem>>, vector<16x32xf32>,
    return
  }
  func.func @transform_0(%arg0: i32, %arg1: i32) -> (i32, i32) {
    %c0_i32 = arith.constant 0 : i32
    %c0_i32_0 = arith.constant 0 : i32
    return %arg0, %c0_i32 : i32, i32
  }
  func.func @transform_1(%arg0: i32, %arg1: i32) -> (i32, i32) {
    %c0_i32 = arith.constant 0 : i32
    %c0_i32_0 = arith.constant 0 : i32
    return %c0_i32, %arg1 : i32, i32
  }
  func.func @transform_2(%arg0: i32, %arg1: i32) -> (i32, i32) {
    %c0_i32 = arith.constant 0 : i32
    %c0_i32_0 = arith.constant 0 : i32
    return %c0_i32, %arg1 : i32, i32
  }
  func.func @transform_3(%arg0: i32, %arg1: i32) -> (i32, i32) {
    %c0_i32 = arith.constant 0 : i32
    return %arg0, %arg1 : i32, i32
  }
  func.func @transform_4(%arg0: i32, %arg1: i32) -> (i32, i32) {
    %c0_i32 = arith.constant 0 : i32
    return %arg0, %arg1 : i32, i32
  }
}

</mosaic_0001>

<bundles_post_ra>
// kernel: transformer_forward.12
= control target key start
LH: loop header
LB: loop body
LE: loop exit
PB: predicated region body
PF: predicated region fallthrough
CT: control target
= control target key end

     0   :  { %vm30_vm0 = vcmask 261120   ;;  %s204_s1 = inlined_call_operand.vmem [shape: f32[32,32], index: 1, kind: input, shape index: {}]   ;;  %s205_s0 = inlined_call_operand.vmem [shape: f32[16,32], index: 0, kind: input, shape index: {}]   ;;  %s206_s2 = inlined_call_operand.vmem [shape: f32[1,32], index: 2, kind: input, shape index: {}]   ;;  %s207_s3 = inlined_call_operand.vmem [shape: f32[16,32], index: 3, kind: input, shape index: {}]   ;;  %s208_s4 = inlined_call_operand.vmem [shape: f32[16,32], index: 4, kind: output, shape index: {}]  }
   0x1   :  { %v22_v0 = vld [vmem:[%s204_s1 + $0x18] sm:$0xff]  ;;  %v21_v1 = vld [vmem:[%s204_s1 + $0x10] sm:$0xff]  ;;  %v17_v2 = vld [vmem:[%s205_s0] sm:$0xff] }
   0x2   :  { %131 = vmatprep.subr.mxu0 %v22_v0  ;;  %v20_v3 = vld [vmem:[%s204_s1 + $0x8] sm:$0xff]  ;;  %139 = vmatprep.mubr.msk.f32.mxu0 %vm30_vm0, %v17_v2  ;;  %v19_v4 = vld [vmem:[%s204_s1] sm:$0xff] }
   0x3   :  { %132 = vmatpush3.msra.mxu0 %v22_v0  ;;  %v18_v5 = vld [vmem:[%s205_s0 + $0x8] sm:$0xff]  ;;  %v122_v6 = vld [vmem:[%s206_s2] ss:$0 sm:$0xff] }
   0x4   :  { %133 = vmatprep.subr.mxu0 %v21_v1  ;;  %v113_v8 = vld [vmem:[%s207_s3 + $0x8] sm:$0xff]  ;;  %v112_v11 = vld [vmem:[%s207_s3] sm:$0xff] }
   0x5   :  { %134 = vmatpush3.msra.mxu0 %v21_v1 }
   0x6   :  { %135 = vmatprep.subr.mxu0 %v20_v3 }
   0x7   :  { %136 = vmatpush3.msra.mxu0 %v20_v3 }
   0x8   :  { %137 = vmatprep.subr.mxu0 %v19_v4 }
   0x9   :  { %138 = vmatpush3.msra.mxu0 %v19_v4 }
   0xa   :  { %140 = vmatmul.mubr.msk.f32.vlgmr.msra.gmra.mxu0 %vm30_vm0, %v18_v5 }
  0xca   :  { %v141_v7 = vpop.f32.mrf.mxu0 }
  0xcb   :  { %v109_v9 = vadd.f32 %v141_v7, %v122_v6 }
  0xcc   :  { %v103_v10 = vpop.f32.mrf.mxu0 }
  0xcd   :  { %v115_v12 = vadd.f32 %v113_v8, %v109_v9  ;;  %v104_v13 = vadd.f32 %v122_v6, %v103_v10 }
  0xcf   :  { %117 = vst.msk [vmem:[%s208_s4 + $0x8] sm:$0xff] %vm30_vm0, %v115_v12  ;;  %v114_v14 = vadd.f32 %v112_v11, %v104_v13 }
  0xd1   :  { %116 = vst.msk [vmem:[%s208_s4] sm:$0xff] %vm30_vm0, %v114_v14 }

// kernel: transformer_forward.10
= control target key start
LH: loop header
LB: loop body
LE: loop exit
PB: predicated region body
PF: predicated region fallthrough
CT: control target
= control target key end

     0   :  { %10 = vsyncpa [#allocation4], 0  ;;  %s242_s18 = smov [#allocation3]   ;;  %s307_s0 = inlined_call_operand.vmem [shape: f32[16,32], index: 0, kind: input, shape index: {}]   ;;  %s308_s1 = inlined_call_operand.vmem [shape: f32[1,32], index: 1, kind: input, shape index: {}]   ;;  %s309_s2 = inlined_call_operand.vmem [shape: f32[1,32], index: 2, kind: input, shape index: {}]   ;;  %s310_s3 = inlined_call_operand.hbm [shape: f32[32,96], index: 3, kind: input, shape index: {}]   ;;  %s311_s4 = inlined_call_operand.vmem [shape: f32[1,96], index: 4, kind: input, shape index: {}]   ;;  %s312_s5 = inlined_call_operand.vmem [shape: f32[16,96], index: 5, kind: output, shape index: {}]  }
   0x1   :  { %s22_s19 = sshll.u32 %s242_s18, 4  ;;  %s23_s19 = int_to_ptr.vmem [resolvable:$true] %s22_s19 }
   0x2   :  { %s228_s20 = scalar_lea.vmem %s23_s19, 512  ;;  %p233_p1 = scmp.lt.s32.totalorder %s23_s19, %s23_s19 }
   0x3   :  { %p229_p0 = scmp.ne.s32.totalorder %s23_s19, %s228_s20  ;;  %p234_p2 = scmp.lt.s32.totalorder %s228_s20, %s228_s20 }
   0x5   :  { %p235_p3 = por %p234_p2, %p233_p1 }
   0x7   :  { %p236_p4 = pnand %p235_p3, %p229_p0 }
   0x9   :  { %239 = shalt.err (!%p236_p4)
}
   0xa   :  { %s243_s21 = smov 128   ;;  %s244_s22 = smov 8  }
   0xb   :  { %28 = dma.hbm_to_vmem [thread:$0]  %s310_s3, 512, %s23_s19, [#allocation4], %s243_s21, %s243_s21, %s244_s22  }
   0xc   :  { %240 = dma.done.wait [#allocation4], 512  }
   0xd   :  { %241 = vsyncadd [#allocation4], 4294966784  ;;  %vm40_vm0 = vcmask 261120   ;;  %v38_v0 = vld [vmem:[%s307_s0] sm:$0xff]  ;;  %v39_v1 = vld [vmem:[%s307_s0 + $0x8] sm:$0xff]  ;;  %vm183_vm1 = vcmask 785408  }
   0xe   :  { %v41_v2 = vsel %vm40_vm0, %v38_v0, 0.0  ;;  %v44_v3 = vsel %vm40_vm0, %v39_v1, 0.0  ;;  %v93_v14 = vld [vmem:[#allocation3 + $0x18] sm:$0xff]  ;;  %v92_v15 = vld [vmem:[#allocation3 + $0x10] sm:$0xff]  ;;  %v91_v16 = vld [vmem:[#allocation3 + $0x8] sm:$0xff] }
   0xf   :  { %42 = vadd.xlane.f32.xlu0 %v41_v2  ;;  %202 = vmatprep.subr.mxu0 %v93_v14  ;;  %v90_v17 = vld [vmem:[#allocation3] sm:$0xff]  ;;  %v191_v25 = vld [vmem:[%s308_s1] ss:$0 sm:$0xff] }
  0x10   :  { %203 = vmatpush3.msra.mxu0 %v93_v14  ;;  %v192_v27 = vld [vmem:[%s309_s2] ss:$0 sm:$0xff] }
  0x11   :  { %204 = vmatprep.subr.mxu0 %v92_v15  ;;  %v193_v36 = vld [vmem:[%s311_s4] ss:$0 sm:$0xff] }
  0x12   :  { %205 = vmatpush3.msra.mxu0 %v92_v15 }
  0x13   :  { %45 = vadd.xlane.f32.xlu0 %v44_v3  ;;  %206 = vmatprep.subr.mxu0 %v91_v16 }
  0x14   :  { %207 = vmatpush3.msra.mxu0 %v91_v16 }
  0x15   :  { %208 = vmatprep.subr.mxu0 %v90_v17 }
  0x16   :  { %209 = vmatpush3.msra.mxu0 %v90_v17 }
  0x98   :  { %v43_v4 = vpop.xlane.xlu0 %42 }
  0x99   :  { %v48_v5 = vmul.f32 0.03125, %v43_v4 }
  0x9b   :  { %v50_v6 = vsub.f32 %v38_v0, %v48_v5 }
  0x9c   :  { %v46_v7 = vpop.xlane.xlu0 %45 }
  0x9d   :  { %v49_v8 = vmul.f32 0.03125, %v46_v7  ;;  %v52_v9 = vmul.f32 %v50_v6, %v50_v6 }
  0x9f   :  { %v51_v10 = vsub.f32 %v39_v1, %v49_v8  ;;  %v54_v11 = vsel %vm40_vm0, %v52_v9, 0.0 }
  0xa0   :  { %55 = vadd.xlane.f32.xlu1 %v54_v11 }
  0xa1   :  { %v53_v12 = vmul.f32 %v51_v10, %v51_v10 }
  0xa3   :  { %v57_v13 = vsel %vm40_vm0, %v53_v12, 0.0 }
  0xa4   :  { %58 = vadd.xlane.f32.xlu1 %v57_v13 }
 0x129   :  { %v56_v18 = vpop.xlane.xlu1 %55 }
 0x12a   :  { %v60_v19 = vmul.f32 0.03125, %v56_v18 }
 0x12c   :  { %v62_v20 = vadd.f32 1e-05, %v60_v19 }
 0x12d   :  { %v59_v21 = vpop.xlane.xlu1 %58 }
 0x12e   :  { %216 = vrsqrt.f32 %v62_v20  ;;  %v61_v22 = vmul.f32 0.03125, %v59_v21 }
 0x130   :  { %v63_v23 = vadd.f32 1e-05, %v61_v22 }
 0x132   :  { %218 = vrsqrt.f32 %v63_v23 }
 0x13b   :  { %v217_v24 = vpop.eup %216 }
 0x13c   :  { %v66_v26 = vmul.f32 %v217_v24, %v50_v6 }
 0x13e   :  { %v75_v28 = vmul.f32 %v191_v25, %v66_v26 }
 0x13f   :  { %v219_v29 = vpop.eup %218 }
 0x140   :  { %v84_v30 = vadd.f32 %v192_v27, %v75_v28  ;;  %v67_v31 = vmul.f32 %v219_v29, %v51_v10 }
 0x142   :  { %86 = vst.msk [vmem:[#allocation2] sm:$0xff] %vm40_vm0, %v84_v30  ;;  %v76_v32 = vmul.f32 %v191_v25, %v67_v31 }
 0x144   :  { %v85_v33 = vadd.f32 %v192_v27, %v76_v32 }
 0x146   :  { %87 = vst.msk [vmem:[#allocation2 + $0x8] sm:$0xff] %vm40_vm0, %v85_v33 }
 0x149   :  { %v88_v34 = vld [vmem:[#allocation2] sm:$0xff] }
 0x14a   :  { %210 = vmatprep.mubr.msk.f32.mxu0 %vm40_vm0, %v88_v34 }
 0x14d   :  { %v89_v35 = vld [vmem:[#allocation2 + $0x8] sm:$0xff] }
 0x14e   :  { %211 = vmatmul.mubr.msk.f32.vlgmr.msra.gmra.mxu0 %vm40_vm0, %v89_v35 }
 0x20e   :  { %v212_v37 = vpop.f32.mrf.mxu0 }
 0x20f   :  { %v180_v38 = vadd.f32 %v212_v37, %v193_v36 }
 0x210   :  { %v174_v39 = vpop.f32.mrf.mxu0 }
 0x211   :  { %185 = vst.msk [vmem:[%s312_s5 + $0x8] sm:$0xff] %vm183_vm1, %v180_v38  ;;  %v175_v40 = vadd.f32 %v193_v36, %v174_v39 }
 0x213   :  { %184 = vst.msk [vmem:[%s312_s5] sm:$0xff] %vm183_vm1, %v175_v40 }
 0x214   :  { %190 = vsyncpa [#allocation4], 1 }

// kernel: transformer_forward.11
= control target key start
LH: loop header
LB: loop body
LE: loop exit
PB: predicated region body
PF: predicated region fallthrough
CT: control target
= control target key end

     0   :  { %s1006_s6 = smov 0   ;;  %s1099_s0 = inlined_call_operand.vmem [shape: f32[2,8,96], index: 0, kind: input, shape index: {}]   ;;  %s1100_s1 = inlined_call_operand.vmem [shape: f32[2,8,32], index: 1, kind: output, shape index: {}]  }
   0x1 LB: > { %s855_s7 = sadd.s32 4294967295, %s978_s6   ;;  %p859_p0 = scmp.ge.s32.totalorder %s978_s6, 1  ;;  %s978_s6 = sphi %s1006_s6, %s11_s6  }
   0x2   : > { %p86_p1 = scmp.lt.s32.totalorder %s978_s6, 3 }
   0x4   : > { %p87_p2 = pnand %p859_p0, %p86_p1 }
   0x5   : > { %p104_p3 = scmp.lt.s32.totalorder (!%p87_p2), %s855_s7, 1  ;;  %s982_s12 = smov (!%p87_p2), 96  }
   0x6   : > { %90 = sbr.rel (%p87_p2) target bundleno = 1160 (0x488), region = 24  ;;  %s983_s13 = smov (!%p87_p2), 64  }
   0x7   : > { %s984_s14 = smov (!%p87_p2), 88   ;;  %s985_s15 = smov (!%p87_p2), 120  }
   0x8   : > { %s986_s16 = smov (!%p87_p2), 80   ;;  %s987_s17 = smov (!%p87_p2), 112  }
   0x9   : > { %s988_s18 = smov (!%p87_p2), 72   ;;  %s989_s19 = smov (!%p87_p2), 104  }
   0xa   : > { %s990_s20 = smov (!%p87_p2), 56   ;;  %s991_s21 = smov (!%p87_p2), 48  }
   0xb   : > { %v980_v0 = vmov 0.0   ;;  %vm981_vm0 = vmmov 0   ;;  %s1102_s7 = smov (!%p104_p3, %s855_s7), 1  ;;  %vm116_vm1 = vcmask 64512   ;;  %s992_s22 = smov 40   ;;  %vm452_vm2 = vcmask 130112  }
   0xc   : > { %892 = vmatprep.subr.mxu0 %v980_v0  ;;  %894 = vmatprep.mubr.msk.f32.mxu0 %vm981_vm0, %v980_v0  ;;  %s860_s8 = sshll.u32 %s1102_s7, 3  ;;  %s993_s26 = smov 8   ;;  %vm626_vm3 = vcmask 195712   ;;  %vm800_vm4 = vcmask 261312  }
   0xd   : > { %897 = vmatprep.subr.mxu1 %v980_v0  ;;  %899 = vmatprep.mubr.msk.f32.mxu1 %vm981_vm0, %v980_v0  ;;  %s107_s11 = scalar_lea.vmem %s1099_s0, %s860_s8  ;;  %s1089_s25 = scalar_lea.vmem %s1100_s1, %s860_s8 }
   0xe   : > { %v1028_v1 = vld [vmem:[%s107_s11] sm:$0xff]  ;;  %s994_s27 = smov 16   ;;  %s995_s28 = smov 24  }
   0xf   : > { %114 = vrot.lane.b32.xlu0 %v1028_v1, %s982_s12  ;;  %201 = vrot.lane.b32.xlu1 %v1028_v1, %s983_s13 }
  0x13   : > { %284 = vrot.lane.b32.xlu1 %v1028_v1, %s984_s14 }
  0x17   : > { %282 = vrot.lane.b32.xlu1 %v1028_v1, %s985_s15 }
  0x1b   : > { %458 = vrot.lane.b32.xlu1 %v1028_v1, %s986_s16 }
  0x1f   : > { %456 = vrot.lane.b32.xlu1 %v1028_v1, %s987_s17 }
  0x23   : > { %632 = vrot.lane.b32.xlu1 %v1028_v1, %s988_s18 }
  0x27   : > { %630 = vrot.lane.b32.xlu1 %v1028_v1, %s989_s19 }
  0x81   : > { %v115_v2 = vpop.permute.xlu0 %114  ;;  %v202_v7 = vpop.permute.xlu1 %201 }
  0x82   : > { %893 = vmatpush3.xpose.msk.msra.mxu0 %vm116_vm1, %v115_v2  ;;  %898 = vmatpush3.msra.mxu1 %v202_v7 }
  0x83   : > { %907 = vmatprep.subr.mxu0 %v980_v0  ;;  %902 = vmatprep.subr.mxu1 %v980_v0 }
  0x85   : > { %895 = vmatmul.mubr.msk.f32.vlgmr.msra.gmra.mxu0 %vm116_vm1, %v1028_v1  ;;  %v285_v8 = vpop.permute.xlu1 %284 }
  0x86   : > { %909 = vmatprep.mubr.msk.f32.mxu0 %vm981_vm0, %v980_v0 }
  0x89   : > { %v283_v12 = vpop.permute.xlu1 %282 }
  0x8d   : > { %v459_v13 = vpop.permute.xlu1 %458 }
  0x91   : > { %v457_v14 = vpop.permute.xlu1 %456 }
  0x95   : > { %v633_v16 = vpop.permute.xlu1 %632 }
  0x99   : > { %v631_v17 = vpop.permute.xlu1 %630 }
 0x145   : > { %v187_v3 = vpop.f32.mrf.mxu0 }
 0x146   : > { %v191_v4 = vmul.f32 0.35355338, %v187_v3 }
 0x147   : > { %v896_v5 = vpop.f32.mrf.mxu0 }
 0x148   : > { %v192_v6 = vsel %vm116_vm1, %v191_v4, -inf }
 0x149   : > { %193 = vmax.xlane.f32.xlu0 %v192_v6 }
 0x15f   : > { %370 = vrot.lane.b32.xlu0 %v1028_v1, %s990_s20 }
 0x1d2   : > { %v194_v9 = vpop.xlane.xlu0 %193 }
 0x1d3   : > { %v195_v10 = vsub.f32 %v191_v4, %v194_v9 }
 0x1d5   : > { %v196_v11 = vmul.f32 1.442695, %v195_v10 }
 0x1d6   : > { %v371_v18 = vpop.permute.xlu0 %370 }
 0x1d7   : > { %956 = vpow2.f32 %v196_v11  ;;  %908 = vmatpush3.msra.mxu0 %v371_v18 }
 0x1d8   : > { %917 = vmatprep.subr.mxu0 %v980_v0 }
 0x1e4   : > { %v1047_v15 = vpop.eup %956 }
 0x1e5   : > { %900 = vmatmul.mubr.msk.f32.vlgmr.msra.gmra.mxu1 %vm116_vm1, %v1047_v15  ;;  %v198_v50 = vsel %vm116_vm1, %v1047_v15, 0.0 }
 0x1e6   : > { %903 = vmatpush3.xpose.msk.msra.mxu1 %vm116_vm1, %v285_v8  ;;  %904 = vmatprep.mubr.msk.f32.mxu1 %vm981_vm0, %v980_v0 }
 0x1e7   : > { %912 = vmatprep.subr.mxu1 %v980_v0 }
 0x1e9   : > { %905 = vmatmul.mubr.msk.f32.vlgmr.msra.gmra.mxu1 %vm116_vm1, %v283_v12 }
 0x1ea   : > { %913 = vmatpush3.xpose.msk.msra.mxu1 %vm116_vm1, %v459_v13  ;;  %914 = vmatprep.mubr.msk.f32.mxu1 %vm981_vm0, %v980_v0 }
 0x1eb   : > { %922 = vmatprep.subr.mxu1 %v980_v0 }
 0x1ed   : > { %915 = vmatmul.mubr.msk.f32.vlgmr.msra.gmra.mxu1 %vm116_vm1, %v457_v14 }
 0x1ee   : > { %923 = vmatpush3.xpose.msk.msra.mxu1 %vm116_vm1, %v633_v16  ;;  %924 = vmatprep.mubr.msk.f32.mxu1 %vm981_vm0, %v980_v0 }
 0x1f1   : > { %925 = vmatmul.mubr.msk.f32.vlgmr.msra.gmra.mxu1 %vm116_vm1, %v631_v17 }
 0x2a5   : > { %v273_v19 = vpop.f32.mrf.mxu1 }
 0x2a7   : > { %v901_v20 = vpop.f32.mrf.mxu1 }
 0x2a9   : > { %v356_v21 = vpop.f32.mrf.mxu1 }
 0x2aa   : > { %v360_v22 = vmul.f32 0.35355338, %v356_v21 }
 0x2ab   : > { %v906_v23 = vpop.f32.mrf.mxu1 }
 0x2ac   : > { %v361_v24 = vsel %vm116_vm1, %v360_v22, -inf }
 0x2ad   : > { %362 = vmax.xlane.f32.xlu1 %v361_v24  ;;  %v530_v25 = vpop.f32.mrf.mxu1 }
 0x2ae   : > { %v534_v26 = vmul.f32 0.35355338, %v530_v25 }
 0x2af   : > { %v916_v27 = vpop.f32.mrf.mxu1 }
 0x2b0   : > { %v535_v28 = vsel %vm116_vm1, %v534_v26, -inf }
 0x2b1   : > { %536 = vmax.xlane.f32.xlu0 %v535_v28  ;;  %v704_v29 = vpop.f32.mrf.mxu1 }
 0x2b2   : > { %v708_v30 = vmul.f32 0.35355338, %v704_v29 }
 0x2b3   : > { %v926_v31 = vpop.f32.mrf.mxu1 }
 0x2b4   : > { %v709_v32 = vsel %vm116_vm1, %v708_v30, -inf }
 0x2b5   : > { %710 = vmax.xlane.f32.xlu0 %v709_v32 }
 0x2be   : > { %544 = vrot.lane.b32.xlu1 %v1028_v1, %s991_s21 }
 0x2cb   : > { %718 = vrot.lane.b32.xlu0 %v1028_v1, %s992_s22 }
 0x336   : > { %v363_v33 = vpop.xlane.xlu1 %362 }
 0x337   : > { %v364_v34 = vsub.f32 %v360_v22, %v363_v33 }
 0x339   : > { %v365_v35 = vmul.f32 1.442695, %v364_v34 }
 0x33a   : > { %v537_v36 = vpop.xlane.xlu0 %536  ;;  %v545_v42 = vpop.permute.xlu1 %544 }
 0x33b   : > { %958 = vpow2.f32 %v365_v35  ;;  %v538_v37 = vsub.f32 %v534_v26, %v537_v36 }
 0x33d   : > { %v539_v38 = vmul.f32 1.442695, %v538_v37 }
 0x33e   : > { %v711_v39 = vpop.xlane.xlu0 %710 }
 0x33f   : > { %960 = vpow2.f32 %v539_v38  ;;  %v712_v40 = vsub.f32 %v708_v30, %v711_v39 }
 0x341   : > { %v713_v41 = vmul.f32 1.442695, %v712_v40 }
 0x342   : > { %v719_v45 = vpop.permute.xlu0 %718 }
 0x343   : > { %962 = vpow2.f32 %v713_v41 }
 0x348   : > { %v959_v43 = vpop.eup %958 }
 0x349   : > { %910 = vmatmul.mubr.msk.f32.vlgmr.msra.gmra.mxu0 %vm116_vm1, %v959_v43  ;;  %v367_v44 = vsel %vm116_vm1, %v959_v43, 0.0 }
 0x34a   : > { %918 = vmatpush3.msra.mxu0 %v545_v42  ;;  %368 = vadd.xlane.f32.xlu0 %v367_v44 }
 0x34b   : > { %919 = vmatprep.mubr.msk.f32.mxu0 %vm981_vm0, %v980_v0  ;;  %927 = vmatprep.subr.mxu0 %v980_v0 }
 0x34c   : > { %v961_v46 = vpop.eup %960 }
 0x34d   : > { %920 = vmatmul.mubr.msk.f32.vlgmr.msra.gmra.mxu0 %vm116_vm1, %v961_v46  ;;  %v541_v47 = vsel %vm116_vm1, %v961_v46, 0.0 }
 0x34e   : > { %928 = vmatpush3.msra.mxu0 %v719_v45  ;;  %542 = vadd.xlane.f32.xlu1 %v541_v47 }
 0x34f   : > { %929 = vmatprep.mubr.msk.f32.mxu0 %vm981_vm0, %v980_v0 }
 0x350   : > { %v963_v48 = vpop.eup %962 }
 0x351   : > { %930 = vmatmul.mubr.msk.f32.vlgmr.msra.gmra.mxu0 %vm116_vm1, %v963_v48  ;;  %v715_v49 = vsel %vm116_vm1, %v963_v48, 0.0 }
 0x352   : > { %716 = vadd.xlane.f32.xlu0 %v715_v49 }
 0x356   : > { %199 = vadd.xlane.f32.xlu0 %v198_v50 }
 0x3d3   : > { %v369_v51 = vpop.xlane.xlu0 %368 }
 0x3d7   : > { %v543_v56 = vpop.xlane.xlu1 %542 }
 0x3db   : > { %v717_v52 = vpop.xlane.xlu0 %716 }
 0x3df   : > { %v200_v53 = vpop.xlane.xlu0 %199 }
 0x3e0   : > { %964 = vrcp.f32 %v200_v53 }
 0x3e1   : > { %966 = vrcp.f32 %v369_v51 }
 0x3e2   : > { %968 = vrcp.f32 %v543_v56 }
 0x3e3   : > { %970 = vrcp.f32 %v717_v52 }
 0x3ed   : > { %v965_v54 = vpop.eup %964 }
 0x3ee   : > { %v278_v55 = vmul.f32 %v965_v54, %v273_v19  ;;  %v967_v57 = vpop.eup %966 }
 0x3ef   : > { %v969_v61 = vpop.eup %968 }
 0x3f0   : > { %279 = vst.msk [vmem:[%s1089_s25] sm:$0xff] %vm116_vm1, %v278_v55  ;;  %v971_v1 = vpop.eup %970 }
 0x409   : > { %v442_v58 = vpop.f32.mrf.mxu0 }
 0x40a   : > { %v447_v59 = vmul.f32 %v967_v57, %v442_v58 }
 0x40b   : > { %v911_v60 = vpop.f32.mrf.mxu0 }
 0x40c   : > { %449 = vrot.lane.b32.xlu0 %v447_v59, %s993_s26 }
 0x40d   : > { %v616_v62 = vpop.f32.mrf.mxu0 }
 0x40e   : > { %v621_v63 = vmul.f32 %v969_v61, %v616_v62 }
 0x40f   : > { %v921_v0 = vpop.f32.mrf.mxu0 }
 0x410   : > { %623 = vrot.lane.b32.xlu1 %v621_v63, %s994_s27 }
 0x411   : > { %v790_v2 = vpop.f32.mrf.mxu0 }
 0x412   : > { %v795_v3 = vmul.f32 %v971_v1, %v790_v2 }
 0x413   : > { %v931_v4 = vpop.f32.mrf.mxu0 }
 0x414   : > { %797 = vrot.lane.b32.xlu0 %v795_v3, %s995_s28 }
 0x47e   : > { %v450_v5 = vpop.permute.xlu0 %449 }
 0x47f   : > { %453 = vst.msk [vmem:[%s1089_s25] sm:$0xff] %vm452_vm2, %v450_v5 }
 0x482   : > { %v624_v6 = vpop.permute.xlu1 %623 }
 0x483   : > { %627 = vst.msk [vmem:[%s1089_s25] sm:$0xff] %vm626_vm3, %v624_v6 }
 0x486   : > { %v798_v7 = vpop.permute.xlu0 %797 }
 0x487   : > { %801 = vst.msk [vmem:[%s1089_s25] sm:$0xff] %vm800_vm4, %v798_v7 }
 0x488 PF: > { %s11_s6 = sadd.s32 1, %s978_s6  }
 0x489   : > { %p8_p4 = scmp.ge.s32.totalorder %s11_s6, 4  }
 0x48b   :  { %10 = sbr.rel (!%p8_p4) target bundleno = 1 (0x1), region = 54 }

// kernel: transformer_forward.13
= control target key start
LH: loop header
LB: loop body
LE: loop exit
PB: predicated region body
PF: predicated region fallthrough
CT: control target
= control target key end

     0   :  { %vm26_vm0 = vcmask 261120   ;;  %vm221_vm3 = vcmask 523264   ;;  %s335_s0 = inlined_call_operand.vmem [shape: f32[16,32], index: 0, kind: input, shape index: {}]   ;;  %s336_s3 = inlined_call_operand.vmem [shape: f32[32,64], index: 3, kind: input, shape index: {}]   ;;  %s337_s1 = inlined_call_operand.vmem [shape: f32[1,32], index: 1, kind: input, shape index: {}]   ;;  %s338_s2 = inlined_call_operand.vmem [shape: f32[1,32], index: 2, kind: input, shape index: {}]   ;;  %s339_s4 = inlined_call_operand.vmem [shape: f32[1,64], index: 4, kind: input, shape index: {}]   ;;  %s340_s5 = inlined_call_operand.vmem [shape: f32[16,64], index: 5, kind: output, shape index: {}]  }
   0x1   :  { %v24_v0 = vld [vmem:[%s335_s0] sm:$0xff]  ;;  %v25_v1 = vld [vmem:[%s335_s0 + $0x8] sm:$0xff]  ;;  %v79_v14 = vld [vmem:[%s336_s3 + $0x18] sm:$0xff] }
   0x2   :  { %v27_v2 = vsel %vm26_vm0, %v24_v0, 0.0  ;;  %v30_v3 = vsel %vm26_vm0, %v25_v1, 0.0  ;;  %239 = vmatprep.subr.mxu0 %v79_v14  ;;  %v78_v15 = vld [vmem:[%s336_s3 + $0x10] sm:$0xff]  ;;  %v77_v16 = vld [vmem:[%s336_s3 + $0x8] sm:$0xff]  ;;  %v76_v17 = vld [vmem:[%s336_s3] sm:$0xff] }
   0x3   :  { %28 = vadd.xlane.f32.xlu0 %v27_v2  ;;  %240 = vmatpush3.msra.mxu0 %v79_v14  ;;  %v228_v25 = vld [vmem:[%s337_s1] ss:$0 sm:$0xff] }
   0x4   :  { %241 = vmatprep.subr.mxu0 %v78_v15  ;;  %v229_v27 = vld [vmem:[%s338_s2] ss:$0 sm:$0xff] }
   0x5   :  { %242 = vmatpush3.msra.mxu0 %v78_v15  ;;  %v230_v36 = vld [vmem:[%s339_s4] ss:$0 sm:$0xff]  ;;  %v263_v15 = vmov -1.0  }
   0x6   :  { %243 = vmatprep.subr.mxu0 %v77_v16 }
   0x7   :  { %31 = vadd.xlane.f32.xlu0 %v30_v3  ;;  %244 = vmatpush3.msra.mxu0 %v77_v16 }
   0x8   :  { %245 = vmatprep.subr.mxu0 %v76_v17 }
   0x9   :  { %246 = vmatpush3.msra.mxu0 %v76_v17 }
  0x8c   :  { %v29_v4 = vpop.xlane.xlu0 %28 }
  0x8d   :  { %v34_v5 = vmul.f32 0.03125, %v29_v4 }
  0x8f   :  { %v36_v6 = vsub.f32 %v24_v0, %v34_v5 }
  0x90   :  { %v32_v7 = vpop.xlane.xlu0 %31 }
  0x91   :  { %v35_v8 = vmul.f32 0.03125, %v32_v7  ;;  %v38_v9 = vmul.f32 %v36_v6, %v36_v6 }
  0x93   :  { %v37_v10 = vsub.f32 %v25_v1, %v35_v8  ;;  %v40_v11 = vsel %vm26_vm0, %v38_v9, 0.0 }
  0x94   :  { %41 = vadd.xlane.f32.xlu1 %v40_v11 }
  0x95   :  { %v39_v12 = vmul.f32 %v37_v10, %v37_v10 }
  0x97   :  { %v43_v13 = vsel %vm26_vm0, %v39_v12, 0.0 }
  0x98   :  { %44 = vadd.xlane.f32.xlu1 %v43_v13 }
 0x11d   :  { %v42_v18 = vpop.xlane.xlu1 %41 }
 0x11e   :  { %v46_v19 = vmul.f32 0.03125, %v42_v18 }
 0x120   :  { %v48_v20 = vadd.f32 1e-05, %v46_v19 }
 0x121   :  { %v45_v21 = vpop.xlane.xlu1 %44 }
 0x122   :  { %251 = vrsqrt.f32 %v48_v20  ;;  %v47_v22 = vmul.f32 0.03125, %v45_v21 }
 0x124   :  { %v49_v23 = vadd.f32 1e-05, %v47_v22 }
 0x126   :  { %253 = vrsqrt.f32 %v49_v23 }
 0x12f   :  { %v252_v24 = vpop.eup %251 }
 0x130   :  { %v52_v26 = vmul.f32 %v252_v24, %v36_v6 }
 0x132   :  { %v61_v28 = vmul.f32 %v228_v25, %v52_v26 }
 0x133   :  { %v254_v29 = vpop.eup %253 }
 0x134   :  { %v70_v30 = vadd.f32 %v229_v27, %v61_v28  ;;  %v53_v31 = vmul.f32 %v254_v29, %v37_v10 }
 0x136   :  { %72 = vst.msk [vmem:[#allocation2] sm:$0xff] %vm26_vm0, %v70_v30  ;;  %v62_v32 = vmul.f32 %v228_v25, %v53_v31 }
 0x138   :  { %v71_v33 = vadd.f32 %v229_v27, %v62_v32 }
 0x13a   :  { %73 = vst.msk [vmem:[#allocation2 + $0x8] sm:$0xff] %vm26_vm0, %v71_v33 }
 0x13d   :  { %v74_v34 = vld [vmem:[#allocation2] sm:$0xff] }
 0x13e   :  { %247 = vmatprep.mubr.msk.f32.mxu0 %vm26_vm0, %v74_v34 }
 0x141   :  { %v75_v35 = vld [vmem:[#allocation2 + $0x8] sm:$0xff] }
 0x142   :  { %248 = vmatmul.mubr.msk.f32.vlgmr.msra.gmra.mxu0 %vm26_vm0, %v75_v35 }
 0x202   :  { %v249_v37 = vpop.f32.mrf.mxu0 }
 0x203   :  { %v166_v38 = vadd.f32 %v249_v37, %v230_v36 }
 0x204   :  { %v160_v39 = vpop.f32.mrf.mxu0 }
 0x205   :  { %v172_v40 = vmul.f32 0.70710677, %v166_v38  ;;  %v161_v41 = vadd.f32 %v230_v36, %v160_v39  ;;  %v170_v20 = vmul.f32 0.5, %v166_v38 }
 0x207   :  { %v178_v42 = vand.u32 2147483647, %v172_v40  ;;  %v171_v43 = vmul.f32 0.70710677, %v161_v41  ;;  %vm174_vm1 = vcmp.ge.f32.partialorder %v172_v40, 0.0  ;;  %v169_v25 = vmul.f32 0.5, %v161_v41 }
 0x208   :  { %v176_v16 = vsel %vm174_vm1, 1.0, %v263_v15 }
 0x209   :  { %v180_v44 = vmul.f32 0.3275911, %v178_v42  ;;  %v177_v45 = vand.u32 2147483647, %v171_v43  ;;  %v204_v49 = vsub.f32 0.0, %v178_v42  ;;  %vm173_vm2 = vcmp.ge.f32.partialorder %v171_v43, 0.0 }
 0x20a   :  { %v175_v22 = vsel %vm173_vm2, 1.0, %v263_v15 }
 0x20b   :  { %v182_v46 = vadd.f32 1.0, %v180_v44  ;;  %v179_v47 = vmul.f32 0.3275911, %v177_v45  ;;  %v203_v50 = vsub.f32 0.0, %v177_v45  ;;  %v206_v51 = vmul.f32 %v204_v49, %v178_v42 }
 0x20d   :  { %255 = vrcp.f32 %v182_v46  ;;  %v181_v48 = vadd.f32 1.0, %v179_v47  ;;  %v205_v53 = vmul.f32 %v203_v50, %v177_v45  ;;  %v209_v55 = vmul.f32 1.442695, %v206_v51 }
 0x20f   :  { %257 = vrcp.f32 %v181_v48  ;;  %v207_v59 = vmul.f32 1.442695, %v205_v53 }
 0x210   :  { %259 = vpow2.f32 %v209_v55 }
 0x211   :  { %261 = vpow2.f32 %v207_v59 }
 0x21a   :  { %v256_v52 = vpop.eup %255 }
 0x21b   :  { %v186_v54 = vmul.f32 1.0614054, %v256_v52 }
 0x21c   :  { %v258_v56 = vpop.eup %257 }
 0x21d   :  { %v188_v57 = vadd.f32 -1.4531521, %v186_v54  ;;  %v185_v58 = vmul.f32 1.0614054, %v258_v56  ;;  %v260_v9 = vpop.eup %259 }
 0x21e   :  { %v262_v13 = vpop.eup %261 }
 0x21f   :  { %v190_v60 = vmul.f32 %v256_v52, %v188_v57  ;;  %v187_v61 = vadd.f32 -1.4531521, %v185_v58 }
 0x221   :  { %v192_v62 = vadd.f32 1.4214138, %v190_v60  ;;  %v189_v63 = vmul.f32 %v258_v56, %v187_v61 }
 0x223   :  { %v194_v0 = vmul.f32 %v256_v52, %v192_v62  ;;  %v191_v1 = vadd.f32 1.4214138, %v189_v63 }
 0x225   :  { %v196_v2 = vadd.f32 -0.28449672, %v194_v0  ;;  %v193_v3 = vmul.f32 %v258_v56, %v191_v1 }
 0x227   :  { %v198_v4 = vmul.f32 %v256_v52, %v196_v2  ;;  %v195_v5 = vadd.f32 -0.28449672, %v193_v3 }
 0x229   :  { %v200_v6 = vadd.f32 0.2548296, %v198_v4  ;;  %v197_v7 = vmul.f32 %v258_v56, %v195_v5 }
 0x22b   :  { %v202_v8 = vmul.f32 %v256_v52, %v200_v6  ;;  %v199_v10 = vadd.f32 0.2548296, %v197_v7 }
 0x22d   :  { %v212_v11 = vmul.f32 %v260_v9, %v202_v8  ;;  %v201_v12 = vmul.f32 %v258_v56, %v199_v10 }
 0x22f   :  { %v214_v14 = vsub.f32 1.0, %v212_v11  ;;  %v211_v17 = vmul.f32 %v262_v13, %v201_v12 }
 0x231   :  { %v216_v18 = vmul.f32 %v214_v14, %v176_v16  ;;  %v213_v19 = vsub.f32 1.0, %v211_v17 }
 0x233   :  { %v218_v21 = vadd.f32 1.0, %v216_v18  ;;  %v215_v23 = vmul.f32 %v213_v19, %v175_v22 }
 0x235   :  { %v220_v24 = vmul.f32 %v218_v21, %v170_v20  ;;  %v217_v26 = vadd.f32 1.0, %v215_v23 }
 0x237   :  { %223 = vst.msk [vmem:[%s340_s5 + $0x8] sm:$0xff] %vm221_vm3, %v220_v24  ;;  %v219_v27 = vmul.f32 %v217_v26, %v169_v25 }
 0x239   :  { %222 = vst.msk [vmem:[%s340_s5] sm:$0xff] %vm221_vm3, %v219_v27 }

// kernel: transformer_forward.14
= control target key start
LH: loop header
LB: loop body
LE: loop exit
PB: predicated region body
PF: predicated region fallthrough
CT: control target
= control target key end

     0   :  { %vm34_vm0 = vcmask 523264   ;;  %vm120_vm1 = vcmask 261120   ;;  %s231_s1 = inlined_call_operand.vmem [shape: f32[64,32], index: 1, kind: input, shape index: {}]   ;;  %s232_s0 = inlined_call_operand.vmem [shape: f32[16,64], index: 0, kind: input, shape index: {}]   ;;  %s233_s2 = inlined_call_operand.vmem [shape: f32[1,32], index: 2, kind: input, shape index: {}]   ;;  %s234_s3 = inlined_call_operand.vmem [shape: f32[16,32], index: 3, kind: input, shape index: {}]   ;;  %s235_s4 = inlined_call_operand.vmem [shape: f32[16,32], index: 4, kind: output, shape index: {}]  }
   0x1   :  { %v26_v0 = vld [vmem:[%s231_s1 + $0x38] sm:$0xff]  ;;  %v25_v1 = vld [vmem:[%s231_s1 + $0x30] sm:$0xff]  ;;  %v24_v2 = vld [vmem:[%s231_s1 + $0x28] sm:$0xff] }
   0x2   :  { %140 = vmatprep.subr.mxu0 %v26_v0  ;;  %v17_v3 = vld [vmem:[%s232_s0] sm:$0xff]  ;;  %v22_v5 = vld [vmem:[%s231_s1 + $0x18] sm:$0xff]  ;;  %v21_v6 = vld [vmem:[%s231_s1 + $0x10] sm:$0xff] }
   0x3   :  { %141 = vmatpush3.msra.mxu0 %v26_v0  ;;  %156 = vmatprep.mubr.msk.f32.mxu0 %vm34_vm0, %v17_v3  ;;  %v23_v4 = vld [vmem:[%s231_s1 + $0x20] sm:$0xff]  ;;  %v20_v7 = vld [vmem:[%s231_s1 + $0x8] sm:$0xff] }
   0x4   :  { %142 = vmatprep.subr.mxu0 %v25_v1  ;;  %v19_v8 = vld [vmem:[%s231_s1] sm:$0xff]  ;;  %v18_v9 = vld [vmem:[%s232_s0 + $0x8] sm:$0xff] }
   0x5   :  { %143 = vmatpush3.msra.mxu0 %v25_v1  ;;  %v127_v10 = vld [vmem:[%s233_s2] ss:$0 sm:$0xff]  ;;  %v117_v12 = vld [vmem:[%s234_s3 + $0x8] sm:$0xff] }
   0x6   :  { %144 = vmatprep.subr.mxu0 %v24_v2  ;;  %v116_v15 = vld [vmem:[%s234_s3] sm:$0xff] }
   0x7   :  { %145 = vmatpush3.msra.mxu0 %v24_v2 }
   0x8   :  { %146 = vmatprep.subr.mxu0 %v23_v4 }
   0x9   :  { %147 = vmatpush3.msra.mxu0 %v23_v4 }
   0xa   :  { %148 = vmatprep.subr.mxu0 %v22_v5 }
   0xb   :  { %149 = vmatpush3.msra.mxu0 %v22_v5 }
   0xc   :  { %150 = vmatprep.subr.mxu0 %v21_v6 }
   0xd   :  { %151 = vmatpush3.msra.mxu0 %v21_v6 }
   0xe   :  { %152 = vmatprep.subr.mxu0 %v20_v7 }
   0xf   :  { %153 = vmatpush3.msra.mxu0 %v20_v7 }
  0x10   :  { %154 = vmatprep.subr.mxu0 %v19_v8 }
  0x11   :  { %155 = vmatpush3.msra.mxu0 %v19_v8 }
  0x12   :  { %157 = vmatmul.mubr.msk.f32.vlgmr.msra.gmra.mxu0 %vm34_vm0, %v18_v9 }
  0xd2   :  { %v158_v11 = vpop.f32.mrf.mxu0 }
  0xd3   :  { %v113_v13 = vadd.f32 %v158_v11, %v127_v10 }
  0xd4   :  { %v107_v14 = vpop.f32.mrf.mxu0 }
  0xd5   :  { %v119_v16 = vadd.f32 %v117_v12, %v113_v13  ;;  %v108_v17 = vadd.f32 %v127_v10, %v107_v14 }
  0xd7   :  { %122 = vst.msk [vmem:[%s235_s4 + $0x8] sm:$0xff] %vm120_vm1, %v119_v16  ;;  %v118_v18 = vadd.f32 %v116_v15, %v108_v17 }
  0xd9   :  { %121 = vst.msk [vmem:[%s235_s4] sm:$0xff] %vm120_vm1, %v118_v18 }

// kernel: transformer_forward.15
= control target key start
LH: loop header
LB: loop body
LE: loop exit
PB: predicated region body
PF: predicated region fallthrough
CT: control target
= control target key end

     0   :  { %vm26_vm0 = vcmask 261120   ;;  %vm169_vm1 = vcmask 785408   ;;  %s273_s0 = inlined_call_operand.vmem [shape: f32[16,32], index: 0, kind: input, shape index: {}]   ;;  %s274_s3 = inlined_call_operand.vmem [shape: f32[32,96], index: 3, kind: input, shape index: {}]   ;;  %s275_s1 = inlined_call_operand.vmem [shape: f32[1,32], index: 1, kind: input, shape index: {}]   ;;  %s276_s2 = inlined_call_operand.vmem [shape: f32[1,32], index: 2, kind: input, shape index: {}]   ;;  %s277_s4 = inlined_call_operand.vmem [shape: f32[1,96], index: 4, kind: input, shape index: {}]   ;;  %s278_s5 = inlined_call_operand.vmem [shape: f32[16,96], index: 5, kind: output, shape index: {}]  }
   0x1   :  { %v24_v0 = vld [vmem:[%s273_s0] sm:$0xff]  ;;  %v25_v1 = vld [vmem:[%s273_s0 + $0x8] sm:$0xff]  ;;  %v79_v14 = vld [vmem:[%s274_s3 + $0x18] sm:$0xff] }
   0x2   :  { %v27_v2 = vsel %vm26_vm0, %v24_v0, 0.0  ;;  %v30_v3 = vsel %vm26_vm0, %v25_v1, 0.0  ;;  %187 = vmatprep.subr.mxu0 %v79_v14  ;;  %v78_v15 = vld [vmem:[%s274_s3 + $0x10] sm:$0xff]  ;;  %v77_v16 = vld [vmem:[%s274_s3 + $0x8] sm:$0xff]  ;;  %v76_v17 = vld [vmem:[%s274_s3] sm:$0xff] }
   0x3   :  { %28 = vadd.xlane.f32.xlu0 %v27_v2  ;;  %188 = vmatpush3.msra.mxu0 %v79_v14  ;;  %v176_v25 = vld [vmem:[%s275_s1] ss:$0 sm:$0xff] }
   0x4   :  { %189 = vmatprep.subr.mxu0 %v78_v15  ;;  %v177_v27 = vld [vmem:[%s276_s2] ss:$0 sm:$0xff] }
   0x5   :  { %190 = vmatpush3.msra.mxu0 %v78_v15  ;;  %v178_v36 = vld [vmem:[%s277_s4] ss:$0 sm:$0xff] }
   0x6   :  { %191 = vmatprep.subr.mxu0 %v77_v16 }
   0x7   :  { %31 = vadd.xlane.f32.xlu0 %v30_v3  ;;  %192 = vmatpush3.msra.mxu0 %v77_v16 }
   0x8   :  { %193 = vmatprep.subr.mxu0 %v76_v17 }
   0x9   :  { %194 = vmatpush3.msra.mxu0 %v76_v17 }
  0x8c   :  { %v29_v4 = vpop.xlane.xlu0 %28 }
  0x8d   :  { %v34_v5 = vmul.f32 0.03125, %v29_v4 }
  0x8f   :  { %v36_v6 = vsub.f32 %v24_v0, %v34_v5 }
  0x90   :  { %v32_v7 = vpop.xlane.xlu0 %31 }
  0x91   :  { %v35_v8 = vmul.f32 0.03125, %v32_v7  ;;  %v38_v9 = vmul.f32 %v36_v6, %v36_v6 }
  0x93   :  { %v37_v10 = vsub.f32 %v25_v1, %v35_v8  ;;  %v40_v11 = vsel %vm26_vm0, %v38_v9, 0.0 }
  0x94   :  { %41 = vadd.xlane.f32.xlu1 %v40_v11 }
  0x95   :  { %v39_v12 = vmul.f32 %v37_v10, %v37_v10 }
  0x97   :  { %v43_v13 = vsel %vm26_vm0, %v39_v12, 0.0 }
  0x98   :  { %44 = vadd.xlane.f32.xlu1 %v43_v13 }
 0x11d   :  { %v42_v18 = vpop.xlane.xlu1 %41 }
 0x11e   :  { %v46_v19 = vmul.f32 0.03125, %v42_v18 }
 0x120   :  { %v48_v20 = vadd.f32 1e-05, %v46_v19 }
 0x121   :  { %v45_v21 = vpop.xlane.xlu1 %44 }
 0x122   :  { %198 = vrsqrt.f32 %v48_v20  ;;  %v47_v22 = vmul.f32 0.03125, %v45_v21 }
 0x124   :  { %v49_v23 = vadd.f32 1e-05, %v47_v22 }
 0x126   :  { %200 = vrsqrt.f32 %v49_v23 }
 0x12f   :  { %v199_v24 = vpop.eup %198 }
 0x130   :  { %v52_v26 = vmul.f32 %v199_v24, %v36_v6 }
 0x132   :  { %v61_v28 = vmul.f32 %v176_v25, %v52_v26 }
 0x133   :  { %v201_v29 = vpop.eup %200 }
 0x134   :  { %v70_v30 = vadd.f32 %v177_v27, %v61_v28  ;;  %v53_v31 = vmul.f32 %v201_v29, %v37_v10 }
 0x136   :  { %72 = vst.msk [vmem:[#allocation2] sm:$0xff] %vm26_vm0, %v70_v30  ;;  %v62_v32 = vmul.f32 %v176_v25, %v53_v31 }
 0x138   :  { %v71_v33 = vadd.f32 %v177_v27, %v62_v32 }
 0x13a   :  { %73 = vst.msk [vmem:[#allocation2 + $0x8] sm:$0xff] %vm26_vm0, %v71_v33 }
 0x13d   :  { %v74_v34 = vld [vmem:[#allocation2] sm:$0xff] }
 0x13e   :  { %195 = vmatprep.mubr.msk.f32.mxu0 %vm26_vm0, %v74_v34 }
 0x141   :  { %v75_v35 = vld [vmem:[#allocation2 + $0x8] sm:$0xff] }
 0x142   :  { %196 = vmatmul.mubr.msk.f32.vlgmr.msra.gmra.mxu0 %vm26_vm0, %v75_v35 }
 0x202   :  { %v197_v37 = vpop.f32.mrf.mxu0 }
 0x203   :  { %v166_v38 = vadd.f32 %v197_v37, %v178_v36 }
 0x204   :  { %v160_v39 = vpop.f32.mrf.mxu0 }
 0x205   :  { %171 = vst.msk [vmem:[%s278_s5 + $0x8] sm:$0xff] %vm169_vm1, %v166_v38  ;;  %v161_v40 = vadd.f32 %v178_v36, %v160_v39 }
 0x207   :  { %170 = vst.msk [vmem:[%s278_s5] sm:$0xff] %vm169_vm1, %v161_v40 }

// kernel: transformer_forward.19
= control target key start
LH: loop header
LB: loop body
LE: loop exit
PB: predicated region body
PF: predicated region fallthrough
CT: control target
= control target key end

     0   :  { %vm35_vm0 = vcmask 523264   ;;  %s269_s0 = inlined_call_operand.vmem [shape: f32[16,64], index: 0, kind: input, shape index: {}]   ;;  %s270_s1 = inlined_call_operand.vmem [shape: f32[64,32], index: 1, kind: input, shape index: {}]   ;;  %s271_s2 = inlined_call_operand.vmem [shape: f32[1,32], index: 2, kind: input, shape index: {}]   ;;  %s272_s3 = inlined_call_operand.vmem [shape: f32[16,32], index: 3, kind: input, shape index: {}]   ;;  %s273_s4 = inlined_call_operand.hbm [shape: f32[16,32], index: 4, kind: output, shape index: {}]  }
   0x1   :  { %v27_v0 = vld [vmem:[%s270_s1 + $0x38] sm:$0xff]  ;;  %v26_v1 = vld [vmem:[%s270_s1 + $0x30] sm:$0xff]  ;;  %v25_v2 = vld [vmem:[%s270_s1 + $0x28] sm:$0xff] }
   0x2   :  { %153 = vmatprep.subr.mxu0 %v27_v0  ;;  %v18_v3 = vld [vmem:[%s269_s0] sm:$0xff] }
   0x3   :  { %154 = vmatpush3.msra.mxu0 %v27_v0  ;;  %169 = vmatprep.mubr.msk.f32.mxu0 %vm35_vm0, %v18_v3 }
   0x4   :  { %155 = vmatprep.subr.mxu0 %v26_v1 }
   0x5   :  { %9 = vsyncpa [#allocation3], 0  ;;  %156 = vmatpush3.msra.mxu0 %v26_v1  ;;  %v24_v4 = vld [vmem:[%s270_s1 + $0x20] sm:$0xff]  ;;  %v23_v5 = vld [vmem:[%s270_s1 + $0x18] sm:$0xff]  ;;  %vm121_vm1 = vcmask 261120  }
   0x6   :  { %157 = vmatprep.subr.mxu0 %v25_v2  ;;  %v22_v6 = vld [vmem:[%s270_s1 + $0x10] sm:$0xff]  ;;  %v21_v7 = vld [vmem:[%s270_s1 + $0x8] sm:$0xff]  ;;  %v20_v8 = vld [vmem:[%s270_s1] sm:$0xff]  ;;  %s197_s1 = smov [#allocation2]  }
   0x7   :  { %158 = vmatpush3.msra.mxu0 %v25_v2  ;;  %v19_v9 = vld [vmem:[%s269_s0 + $0x8] sm:$0xff]  ;;  %v140_v10 = vld [vmem:[%s271_s2] ss:$0 sm:$0xff]  ;;  %s129_s13 = sshll.u32 %s197_s1, 4  ;;  %s130_s13 = int_to_ptr.vmem [resolvable:$true] %s129_s13 }
   0x8   :  { %159 = vmatprep.subr.mxu0 %v24_v4  ;;  %v118_v12 = vld [vmem:[%s272_s3 + $0x8] sm:$0xff]  ;;  %v117_v15 = vld [vmem:[%s272_s3] sm:$0xff]  ;;  %s175_s2 = scalar_lea.vmem %s130_s13, 256  ;;  %p180_p1 = scmp.lt.s32.totalorder %s130_s13, %s130_s13 }
   0x9   :  { %160 = vmatpush3.msra.mxu0 %v24_v4  ;;  %p176_p0 = scmp.ne.s32.totalorder %s130_s13, %s175_s2  ;;  %p181_p2 = scmp.lt.s32.totalorder %s175_s2, %s175_s2 }
   0xa   :  { %161 = vmatprep.subr.mxu0 %v23_v5 }
   0xb   :  { %162 = vmatpush3.msra.mxu0 %v23_v5  ;;  %p182_p3 = por %p181_p2, %p180_p1 }
   0xc   :  { %163 = vmatprep.subr.mxu0 %v22_v6 }
   0xd   :  { %164 = vmatpush3.msra.mxu0 %v22_v6  ;;  %p183_p4 = pnand %p182_p3, %p176_p0 }
   0xe   :  { %165 = vmatprep.subr.mxu0 %v21_v7 }
   0xf   :  { %166 = vmatpush3.msra.mxu0 %v21_v7 }
  0x10   :  { %167 = vmatprep.subr.mxu0 %v20_v8 }
  0x11   :  { %168 = vmatpush3.msra.mxu0 %v20_v8 }
  0x12   :  { %170 = vmatmul.mubr.msk.f32.vlgmr.msra.gmra.mxu0 %vm35_vm0, %v19_v9 }
  0xd2   :  { %v171_v11 = vpop.f32.mrf.mxu0 }
  0xd3   :  { %v114_v13 = vadd.f32 %v171_v11, %v140_v10 }
  0xd4   :  { %v108_v14 = vpop.f32.mrf.mxu0 }
  0xd5   :  { %v120_v16 = vadd.f32 %v118_v12, %v114_v13  ;;  %v109_v17 = vadd.f32 %v140_v10, %v108_v14 }
  0xd7   :  { %123 = vst.msk [vmem:[#allocation2 + $0x8] sm:$0xff] %vm121_vm1, %v120_v16  ;;  %v119_v18 = vadd.f32 %v117_v15, %v109_v17 }
  0xd9   :  { %122 = vst.msk [vmem:[#allocation2] sm:$0xff] %vm121_vm1, %v119_v18 }
  0xda   :  { %186 = shalt.err (!%p183_p4)
}
  0xdb   :  { %s198_s15 = smov 128   ;;  %s199_s16 = smov 8  }
  0xdc   :  { %135 = dma.vmem_to_hbm [thread:$0]  %s130_s13, 256, %s273_s4, [#allocation3], %s198_s15, %s198_s15, %s199_s16  }
  0xdd   :  { %195 = dma.done.wait [#allocation3], 256  }
  0xde   :  { %196 = vsyncadd [#allocation3], 4294967040 }
  0xdf   :  { %139 = vsyncpa [#allocation3], 1 }

</bundles_post_ra>
